<compile_context>
chip_gen: v6e
topology: v6e:2x2x1
jax: 0.10.0
libtpu: 0.0.40
codegen_flags: <defaults>
</compile_context>

<pallas_src>
import jax
import jax.numpy as jnp
from jax.experimental import pallas as pl
from jax.experimental.pallas import tpu as pltpu

BN_EPS = 1e-5
NUM_CLASSES = 4      # NUM_CLASSES is undefined in the source snippet; fixed here.
C1, C2, HID = 16, 32, 128
BT_MAX = 128         # batch-tile cap (per grid step)
ALIGN = 16           # batch alignment (sublane-friendly)
MAX_ROWS = 2048      # max (positions * Bt) rows live per in-kernel chunk
FC_GROUP = 4         # pooled-2 positions packed per fc1 matmul (K = 4*C2 = 128)


def _round_up(a, m):
    return ((a + m - 1) // m) * m


def _make_kernel(L, Bt, c_in, CL, CH):
    LH, L2 = L // 2, L // 4
    K1, K2 = 3 * c_in, 3 * C1

    def kernel(x_ref, w1_ref, w2_ref, wfc1_ref, wfc2_ref, vec_ref, o_ref, p1_ref):
        # packed per-channel vectors (folded BN scale/shift, fc biases)
        s1 = vec_ref[0:1, 0:C1]
        t1 = vec_ref[1:2, 0:C1]
        s2 = vec_ref[2:3, 0:C2]
        t2 = vec_ref[3:4, 0:C2]
        bfc1 = vec_ref[4:5, 0:HID]
        bfc2 = vec_ref[5:6, :]

        # zero halo rows of the pooled-1 scratch (conv2 has pad=1)
        zrow = jnp.zeros((1, Bt, C1), jnp.float32)
        p1_ref[0:1] = zrow
        p1_ref[LH + 1:LH + 2] = zrow

        # ---- stage A: conv1 (single K=3*c_in matmul; im2col done wrapper-side)
        #      + folded BN + ReLU + maxpool1, processed in L-chunks of CL positions.
        for a in range(0, L, CL):
            n = min(CL, L - a)                           # even (L and CL are even)
            lhs = x_ref[a:a + n].reshape(n * Bt, K1)     # bf16
            acc = jnp.dot(lhs, w1_ref[...], preferred_element_type=jnp.float32)
            h = jnp.maximum(acc * s1 + t1, 0.0)          # (n*Bt, C1) f32
            hr = h.reshape(n // 2, 2, Bt, C1)
            # one contiguous (unmasked) store per chunk, f32 pooled values
            p1_ref[a // 2 + 1:a // 2 + 1 + n // 2] = jnp.maximum(hr[:, 0], hr[:, 1])

        # ---- stage B: conv2 (single K=48 matmul per chunk via lane concat of the
        #      3 shifted haloed reads) + folded BN + ReLU + maxpool2 + packed fc1.
        acc_fc = jnp.zeros((Bt, HID), jnp.float32) + bfc1
        for c0 in range(0, LH, CH):
            m = min(CH, LH - c0)                         # even
            lhs2 = jnp.concatenate(
                [p1_ref[c0 + k:c0 + k + m] for k in range(3)], axis=-1)
            acc2 = jnp.dot(lhs2.astype(jnp.bfloat16).reshape(m * Bt, K2),
                           w2_ref[...], preferred_element_type=jnp.float32)
            h2 = jnp.maximum(acc2 * s2 + t2, 0.0)        # (m*Bt, C2) f32
            h2r = h2.reshape(m // 2, 2, Bt, C2)
            p2 = jnp.maximum(h2r[:, 0], h2r[:, 1])       # (m//2, Bt, C2) f32
            m2 = m // 2
            l2_0 = c0 // 2                               # global pooled-2 offset
            j = 0
            while j < m2:
                g = min(FC_GROUP, m2 - j)
                if g == 1:
                    grp = p2[j]
                else:
                    grp = jnp.concatenate([p2[j + t] for t in range(g)], axis=-1)
                w_rows = wfc1_ref[(l2_0 + j) * C2:(l2_0 + j + g) * C2, :]
                acc_fc = acc_fc + jnp.dot(grp.astype(jnp.bfloat16), w_rows,
                                          preferred_element_type=jnp.float32)
                j += g

        # fc1 ReLU -> Dropout(p=0.5) is identity at inference -> fc2.
        # TODO(synk): train-mode dropout RNG and batch-statistics BatchNorm are not
        # implemented; eval-mode semantics are used.
        f = jnp.maximum(acc_fc, 0.0).astype(jnp.bfloat16)
        # single lane-dense (Bt, 128) store; wrapper slices back to NUM_CLASSES
        o_ref[...] = jnp.dot(f, wfc2_ref[...],
                             preferred_element_type=jnp.float32) + bfc2

    return kernel


def baseline_cnn_forward(x_ncl, params):
    """x_ncl: (B, C_in, L) float32, exactly like the PyTorch module input."""
    B, c_in, L = x_ncl.shape
    assert L % 4 == 0, "two MaxPool1d(2) stages imply L divisible by 4"
    NC = params["w_fc2"].shape[0]
    assert NC <= 128
    NCP = 128
    LH, L2 = L // 2, L // 4

    # ---- batch tiling: >=2 grid steps whenever the batch allows it (v7x has two
    # TensorCores); bound Bt so the double-buffered input block stays in VMEM.
    bpad_min = _round_up(B, ALIGN)
    if bpad_min >= 2 * ALIGN:
        Bt = min(BT_MAX, _round_up((bpad_min + 1) // 2, ALIGN))
    else:
        Bt = bpad_min
    while Bt > ALIGN and 2 * (L * Bt * 3 * c_in * 2) > 24 * (1 << 20):
        Bt -= ALIGN
    Bpad = _round_up(bpad_min, Bt)
    num_tiles = Bpad // Bt

    # ---- in-kernel L-chunk sizes (bound the live f32 intermediates)
    rows = max(2, MAX_ROWS // Bt)
    CL = min(L, rows - rows % 2)
    ch = rows - rows % (2 * FC_GROUP)
    CH = min(LH, ch if ch >= 2 * FC_GROUP else rows - rows % 2)

    # ---- input: batch-pad, position-major channels-last, im2col the 3 conv1 taps
    # along the channel (lane) axis -> one K=3*c_in matmul per chunk in the kernel.
    xb = jnp.pad(x_ncl, ((0, Bpad - B), (0, 0), (0, 0)))
    xt = jnp.transpose(xb, (2, 0, 1))                        # (L, Bpad, c_in)
    xt = jnp.pad(xt, ((1, 1), (0, 0), (0, 0)))               # zero halo (pad=1)
    x_im = jnp.concatenate([xt[0:L], xt[1:L + 1], xt[2:L + 2]],
                           axis=-1).astype(jnp.bfloat16)     # (L, Bpad, 3*c_in)

    # conv weights: torch (C_out, C_in, k) -> (k*C_in, C_out) im2col order, bf16
    w1 = jnp.transpose(params["w_conv1"], (2, 1, 0)).reshape(3 * c_in, C1)
    w1 = w1.astype(jnp.bfloat16)
    w2 = jnp.transpose(params["w_conv2"], (2, 1, 0)).reshape(3 * C1, C2)
    w2 = w2.astype(jnp.bfloat16)

    def bn_fold(gamma, beta, mean, var, b_conv):
        scale = gamma / jnp.sqrt(var + BN_EPS)
        shift = (b_conv - mean) * scale + beta
        return scale.astype(jnp.float32), shift.astype(jnp.float32)

    s1, t1 = bn_fold(params["bn1_gamma"], params["bn1_beta"],
                     params["bn1_mean"], params["bn1_var"], params["b_conv1"])
    s2, t2 = bn_fold(params["bn2_gamma"], params["bn2_beta"],
                     params["bn2_mean"], params["bn2_var"], params["b_conv2"])

    # fc1: torch (HID, C2*L2) with flatten index c*L2 + l -> rows ordered l*C2 + c
    # (matches the in-kernel position-packed LHS).
    wfc1 = jnp.transpose(params["w_fc1"].reshape(HID, C2, L2), (2, 1, 0))
    wfc1 = wfc1.reshape(L2 * C2, HID).astype(jnp.bfloat16)

    # fc2: zero-pad the NC output columns to a lane-dense width of 128
    wfc2 = jnp.zeros((HID, NCP), jnp.bfloat16)
    wfc2 = wfc2.at[:, :NC].set(jnp.transpose(params["w_fc2"]).astype(jnp.bfloat16))
    bfc2 = jnp.zeros((NCP,), jnp.float32).at[:NC].set(params["b_fc2"])

    # pack the 6 tiny per-channel vectors into a single (8, 128) f32 input
    vecs = jnp.zeros((8, 128), jnp.float32)
    vecs = vecs.at[0, :C1].set(s1).at[1, :C1].set(t1)
    vecs = vecs.at[2, :C2].set(s2).at[3, :C2].set(t2)
    vecs = vecs.at[4, :HID].set(params["b_fc1"].astype(jnp.float32))
    vecs = vecs.at[5, :].set(bfc2)

    # explicit scoped-VMEM budget (v7x: 64 MiB physical, 32 MiB default scope)
    est = (2 * L * Bt * 3 * c_in * 2                      # input blocks (x2 pipeline)
           + (LH + 2) * Bt * C1 * 4                       # pooled-1 scratch (f32)
           + 2 * (3 * c_in * C1 + 3 * C1 * C2 + L2 * C2 * HID + HID * NCP) * 2
           + 2 * 8 * 128 * 4
           + 2 * Bt * NCP * 4)                            # output blocks
    vmem_limit = int(min(64 << 20, max(32 << 20, est + (8 << 20))))

    kernel = _make_kernel(L, Bt, c_in, CL, CH)
    out = pl.pallas_call(
        kernel,
        out_shape=jax.ShapeDtypeStruct((Bpad, NCP), jnp.float32),
        grid_spec=pltpu.PrefetchScalarGridSpec(
            num_scalar_prefetch=0,
            grid=(num_tiles,),
            in_specs=[
                pl.BlockSpec((L, Bt, 3 * c_in), lambda t: (0, t, 0)),
                pl.BlockSpec((3 * c_in, C1), lambda t: (0, 0)),
                pl.BlockSpec((3 * C1, C2), lambda t: (0, 0)),
                pl.BlockSpec((L2 * C2, HID), lambda t: (0, 0)),
                pl.BlockSpec((HID, NCP), lambda t: (0, 0)),
                pl.BlockSpec((8, 128), lambda t: (0, 0)),
            ],
            out_specs=pl.BlockSpec((Bt, NCP), lambda t: (t, 0)),
            scratch_shapes=[
                pltpu.VMEM((LH + 2, Bt, C1), jnp.float32),   # zero-haloed pooled-1
            ],
        ),
        compiler_params=pltpu.CompilerParams(
            dimension_semantics=("parallel",),
            vmem_limit_bytes=vmem_limit,
        ),
    )(x_im, w1, w2, wfc1, wfc2, vecs)
    return out[:B, :NC]


def init_params(key, c_in, L, num_classes):
    """Deterministic synthetic parameters matching BaselineCNN shapes."""
    flattened = C2 * (L // 4)
    ks = jax.random.split(key, 18)
    f32 = jnp.float32
    return {
        "w_conv1": 0.1 * jax.random.normal(ks[0], (C1, c_in, 3), f32),
        "b_conv1": 0.05 * jax.random.normal(ks[1], (C1,), f32),
        "bn1_gamma": 1.0 + 0.1 * jax.random.normal(ks[2], (C1,), f32),
        "bn1_beta": 0.05 * jax.random.normal(ks[3], (C1,), f32),
        "bn1_mean": 0.05 * jax.random.normal(ks[4], (C1,), f32),
        "bn1_var": 1.0 + 0.2 * jax.random.uniform(ks[5], (C1,), f32),
        "w_conv2": 0.1 * jax.random.normal(ks[6], (C2, C1, 3), f32),
        "b_conv2": 0.05 * jax.random.normal(ks[7], (C2,), f32),
        "bn2_gamma": 1.0 + 0.1 * jax.random.normal(ks[8], (C2,), f32),
        "bn2_beta": 0.05 * jax.random.normal(ks[9], (C2,), f32),
        "bn2_mean": 0.05 * jax.random.normal(ks[10], (C2,), f32),
        "bn2_var": 1.0 + 0.2 * jax.random.uniform(ks[11], (C2,), f32),
        "w_fc1": 0.05 * jax.random.normal(ks[12], (HID, flattened), f32),
        "b_fc1": 0.05 * jax.random.normal(ks[13], (HID,), f32),
        "w_fc2": 0.05 * jax.random.normal(ks[14], (num_classes, HID), f32),
        "b_fc2": 0.05 * jax.random.normal(ks[15], (num_classes,), f32),
    }


def ref_forward(x, p):
    """Pure-JAX f32 reference mirroring the PyTorch forward (eval mode)."""
    B, c_in, L = x.shape

    def block(h, w, b, gamma, beta, mean, var):
        _, _, Lc = h.shape
        co = w.shape[0]
        hp = jnp.pad(h, ((0, 0), (0, 0), (1, 1)))
        y = jnp.broadcast_to(b[None, :, None], (B, co, Lc)).astype(jnp.float32)
        for k in range(3):
            y = y + jnp.einsum("oi,bil->bol", w[:, :, k], hp[:, :, k:k + Lc])
        y = (y - mean[None, :, None]) / jnp.sqrt(var[None, :, None] + BN_EPS)
        y = y * gamma[None, :, None] + beta[None, :, None]
        y = jnp.maximum(y, 0.0)
        return jnp.max(y.reshape(B, co, Lc // 2, 2), axis=-1)

    h = block(x, p["w_conv1"], p["b_conv1"], p["bn1_gamma"], p["bn1_beta"],
              p["bn1_mean"], p["bn1_var"])
    h = block(h, p["w_conv2"], p["b_conv2"], p["bn2_gamma"], p["bn2_beta"],
              p["bn2_mean"], p["bn2_var"])
    flat = h.reshape(B, -1)                            # torch .view: (C, L) order
    f = jnp.maximum(flat @ p["w_fc1"].T + p["b_fc1"], 0.0)
    return f @ p["w_fc2"].T + p["b_fc2"]


if __name__ == "__main__":
    B, C_IN, L = 2, 8, 32   # small shapes; L divisible by 4 as the forward implies
    key = jax.random.PRNGKey(0)
    kx, kp = jax.random.split(key)
    x = jax.random.normal(kx, (B, C_IN, L), jnp.float32)
    params = init_params(kp, C_IN, L, NUM_CLASSES)

    out = baseline_cnn_forward(x, params)
    out = jax.block_until_ready(out)

    ref = ref_forward(x, params)
    assert out.shape == (B, NUM_CLASSES), out.shape
    # bf16 matmul operands with f32 accumulation -> slightly relaxed tolerance
    assert jnp.allclose(out, ref, rtol=2e-2, atol=2e-2), (out, ref)
    print("KERNEL_OK")
</pallas_src>

<mosaic_0001>
module attributes {stable_mosaic.version = 11 : i64} {
  func.func @kernel(%arg0: i32, %arg1: memref<32x16x24xbf16, #tpu.memory_space<vmem>>, %arg2: memref<24x16xbf16, #tpu.memory_space<vmem>>, %arg3: memref<48x32xbf16, #tpu.memory_space<vmem>>, %arg4: memref<256x128xbf16, #tpu.memory_space<vmem>>, %arg5: memref<128x128xbf16, #tpu.memory_space<vmem>>, %arg6: memref<8x128xf32, #tpu.memory_space<vmem>>, %arg7: memref<16x128xf32, #tpu.memory_space<vmem>>, %arg8: memref<18x16x16xf32, #tpu.memory_space<vmem>>) attributes {dimension_semantics = [#tpu.dimension_semantics<parallel>], iteration_bounds = array<i64: 1>, scalar_prefetch = 0 : i64, scratch_operands = 1 : i64, tpu.core_type = #tpu.core_type<tc>, window_params = [{transform_indices = @transform_0, window_bounds = array<i64: 32, 16, 24>}, {pipeline_mode = #tpu.pipeline_mode<synchronous>, transform_indices = @transform_1, window_bounds = array<i64: 24, 16>}, {pipeline_mode = #tpu.pipeline_mode<synchronous>, transform_indices = @transform_2, window_bounds = array<i64: 48, 32>}, {pipeline_mode = #tpu.pipeline_mode<synchronous>, transform_indices = @transform_3, window_bounds = array<i64: 256, 128>}, {pipeline_mode = #tpu.pipeline_mode<synchronous>, transform_indices = @transform_4, window_bounds = array<i64: 128, 128>}, {pipeline_mode = #tpu.pipeline_mode<synchronous>, transform_indices = @transform_5, window_bounds = array<i64: 8, 128>}, {transform_indices = @transform_6, window_bounds = array<i64: 16, 128>}]} {
    %c0 = arith.constant 0 : index
    %c0_0 = arith.constant 0 : index
    %0 = vector.load %arg6[%c0, %c0_0] : memref<8x128xf32, #tpu.memory_space<vmem>>, vector<1x16xf32>
    %c1 = arith.constant 1 : index
    %c0_1 = arith.constant 0 : index
    %1 = vector.load %arg6[%c1, %c0_1] : memref<8x128xf32, #tpu.memory_space<vmem>>, vector<1x16xf32>
    %c2 = arith.constant 2 : index
    %c0_2 = arith.constant 0 : index
    %2 = vector.load %arg6[%c2, %c0_2] : memref<8x128xf32, #tpu.memory_space<vmem>>, vector<1x32xf32>
    %c3 = arith.constant 3 : index
    %c0_3 = arith.constant 0 : index
    %3 = vector.load %arg6[%c3, %c0_3] : memref<8x128xf32, #tpu.memory_space<vmem>>, vector<1x32xf32>
    %c4 = arith.constant 4 : index
    %c0_4 = arith.constant 0 : index
    %4 = vector.load %arg6[%c4, %c0_4] : memref<8x128xf32, #tpu.memory_space<vmem>>, vector<1x128xf32>
    %c5 = arith.constant 5 : index
    %c0_5 = arith.constant 0 : index
    %5 = vector.load %arg6[%c5, %c0_5] : memref<8x128xf32, #tpu.memory_space<vmem>>, vector<1x128xf32>
    %cst = arith.constant 0.000000e+00 : f32
    %6 = vector.broadcast %cst : f32 to vector<1x16x16xf32>
    %c0_6 = arith.constant 0 : index
    %c0_7 = arith.constant 0 : index
    %c0_8 = arith.constant 0 : index
    %7 = vector.load %arg8[%c0_6, %c0_7, %c0_8] : memref<18x16x16xf32, #tpu.memory_space<vmem>>, vector<1x16x16xf32>
    tpu.vector_store %arg8[%c0_6, %c0_7, %c0_8], %6 {strides = array<i32>} : memref<18x16x16xf32, #tpu.memory_space<vmem>>, vector<1x16x16xf32>,
    %c17 = arith.constant 17 : index
    %c0_9 = arith.constant 0 : index
    %c0_10 = arith.constant 0 : index
    %8 = vector.load %arg8[%c17, %c0_9, %c0_10] : memref<18x16x16xf32, #tpu.memory_space<vmem>>, vector<1x16x16xf32>
    tpu.vector_store %arg8[%c17, %c0_9, %c0_10], %6 {strides = array<i32>} : memref<18x16x16xf32, #tpu.memory_space<vmem>>, vector<1x16x16xf32>,
    %c0_11 = arith.constant 0 : index
    %c0_12 = arith.constant 0 : index
    %c0_13 = arith.constant 0 : index
    %9 = vector.load %arg1[%c0_11, %c0_12, %c0_13] : memref<32x16x24xbf16, #tpu.memory_space<vmem>>, vector<32x16x24xbf16>
    %10 = vector.shape_cast %9 : vector<32x16x24xbf16> to vector<512x24xbf16>
    %c0_14 = arith.constant 0 : index
    %c0_15 = arith.constant 0 : index
    %11 = vector.load %arg2[%c0_14, %c0_15] : memref<24x16xbf16, #tpu.memory_space<vmem>>, vector<24x16xbf16>
    %cst_16 = arith.constant dense<0.000000e+00> : vector<512x16xf32>
    %12 = tpu.matmul %10, %11, %cst_16 {dimension_numbers = #tpu.dot_dimension_numbers<[1], [0], [0], [1], [0, 0, 1, 1], [], []>} : vector<512x24xbf16>, vector<24x16xbf16>, vector<512x16xf32> -> vector<512x16xf32>
    %13 = vector.broadcast %0 : vector<1x16xf32> to vector<512x16xf32>
    %14 = arith.mulf %12, %13 : vector<512x16xf32>
    %15 = vector.broadcast %1 : vector<1x16xf32> to vector<512x16xf32>
    %16 = arith.addf %14, %15 : vector<512x16xf32>
    %cst_17 = arith.constant 0.000000e+00 : f32
    %17 = vector.broadcast %cst_17 : f32 to vector<512x16xf32>
    %18 = arith.maximumf %16, %17 : vector<512x16xf32>
    %19 = vector.shape_cast %18 : vector<512x16xf32> to vector<16x2x16x16xf32>
    %20 = vector.extract_strided_slice %19 {offsets = [0, 0, 0, 0], sizes = [16, 1, 16, 16], strides = [1, 1, 1, 1]} : vector<16x2x16x16xf32> to vector<16x1x16x16xf32>
    %21 = vector.shape_cast %20 : vector<16x1x16x16xf32> to vector<16x16x16xf32>
    %22 = vector.extract_strided_slice %19 {offsets = [0, 1, 0, 0], sizes = [16, 1, 16, 16], strides = [1, 1, 1, 1]} : vector<16x2x16x16xf32> to vector<16x1x16x16xf32>
    %23 = vector.shape_cast %22 : vector<16x1x16x16xf32> to vector<16x16x16xf32>
    %24 = arith.maximumf %21, %23 : vector<16x16x16xf32>
    %c1_18 = arith.constant 1 : index
    %c0_19 = arith.constant 0 : index
    %c0_20 = arith.constant 0 : index
    %25 = vector.load %arg8[%c1_18, %c0_19, %c0_20] : memref<18x16x16xf32, #tpu.memory_space<vmem>>, vector<16x16x16xf32>
    tpu.vector_store %arg8[%c1_18, %c0_19, %c0_20], %24 {strides = array<i32>} : memref<18x16x16xf32, #tpu.memory_space<vmem>>, vector<16x16x16xf32>,
    %cst_21 = arith.constant 0.000000e+00 : f32
    %26 = vector.broadcast %cst_21 : f32 to vector<16x128xf32>
    %27 = vector.broadcast %4 : vector<1x128xf32> to vector<16x128xf32>
    %28 = arith.addf %26, %27 : vector<16x128xf32>
    %c0_22 = arith.constant 0 : index
    %c0_23 = arith.constant 0 : index
    %c0_24 = arith.constant 0 : index
    %29 = vector.load %arg8[%c0_22, %c0_23, %c0_24] : memref<18x16x16xf32, #tpu.memory_space<vmem>>, vector<16x16x16xf32>
    %c1_25 = arith.constant 1 : index
    %c0_26 = arith.constant 0 : index
    %c0_27 = arith.constant 0 : index
    %30 = vector.load %arg8[%c1_25, %c0_26, %c0_27] : memref<18x16x16xf32, #tpu.memory_space<vmem>>, vector<16x16x16xf32>
    %c2_28 = arith.constant 2 : index
    %c0_29 = arith.constant 0 : index
    %c0_30 = arith.constant 0 : index
    %31 = vector.load %arg8[%c2_28, %c0_29, %c0_30] : memref<18x16x16xf32, #tpu.memory_space<vmem>>, vector<16x16x16xf32>
    %32 = tpu.concatenate %29, %30, %31 in 2 : vector<16x16x16xf32>, vector<16x16x16xf32>, vector<16x16x16xf32> -> vector<16x16x48xf32>
    %33 = arith.truncf %32 : vector<16x16x48xf32> to vector<16x16x48xbf16>
    %34 = vector.shape_cast %33 : vector<16x16x48xbf16> to vector<256x48xbf16>
    %c0_31 = arith.constant 0 : index
    %c0_32 = arith.constant 0 : index
    %35 = vector.load %arg3[%c0_31, %c0_32] : memref<48x32xbf16, #tpu.memory_space<vmem>>, vector<48x32xbf16>
    %cst_33 = arith.constant dense<0.000000e+00> : vector<256x32xf32>
    %36 = tpu.matmul %34, %35, %cst_33 {dimension_numbers = #tpu.dot_dimension_numbers<[1], [0], [0], [1], [0, 0, 1, 1], [], []>} : vector<256x48xbf16>, vector<48x32xbf16>, vector<256x32xf32> -> vector<256x32xf32>
    %37 = vector.broadcast %2 : vector<1x32xf32> to vector<256x32xf32>
    %38 = arith.mulf %36, %37 : vector<256x32xf32>
    %39 = vector.broadcast %3 : vector<1x32xf32> to vector<256x32xf32>
    %40 = arith.addf %38, %39 : vector<256x32xf32>
    %cst_34 = arith.constant 0.000000e+00 : f32
    %41 = vector.broadcast %cst_34 : f32 to vector<256x32xf32>
    %42 = arith.maximumf %40, %41 : vector<256x32xf32>
    %43 = vector.shape_cast %42 : vector<256x32xf32> to vector<8x2x16x32xf32>
    %44 = vector.extract_strided_slice %43 {offsets = [0, 0, 0, 0], sizes = [8, 1, 16, 32], strides = [1, 1, 1, 1]} : vector<8x2x16x32xf32> to vector<8x1x16x32xf32>
    %45 = vector.shape_cast %44 : vector<8x1x16x32xf32> to vector<8x16x32xf32>
    %46 = vector.extract_strided_slice %43 {offsets = [0, 1, 0, 0], sizes = [8, 1, 16, 32], strides = [1, 1, 1, 1]} : vector<8x2x16x32xf32> to vector<8x1x16x32xf32>
    %47 = vector.shape_cast %46 : vector<8x1x16x32xf32> to vector<8x16x32xf32>
    %48 = arith.maximumf %45, %47 : vector<8x16x32xf32>
    %49 = vector.extract_strided_slice %48 {offsets = [0, 0, 0], sizes = [1, 16, 32], strides = [1, 1, 1]} : vector<8x16x32xf32> to vector<1x16x32xf32>
    %50 = vector.shape_cast %49 : vector<1x16x32xf32> to vector<16x32xf32>
    %51 = vector.extract_strided_slice %48 {offsets = [1, 0, 0], sizes = [1, 16, 32], strides = [1, 1, 1]} : vector<8x16x32xf32> to vector<1x16x32xf32>
    %52 = vector.shape_cast %51 : vector<1x16x32xf32> to vector<16x32xf32>
    %53 = vector.extract_strided_slice %48 {offsets = [2, 0, 0], sizes = [1, 16, 32], strides = [1, 1, 1]} : vector<8x16x32xf32> to vector<1x16x32xf32>
    %54 = vector.shape_cast %53 : vector<1x16x32xf32> to vector<16x32xf32>
    %55 = vector.extract_strided_slice %48 {offsets = [3, 0, 0], sizes = [1, 16, 32], strides = [1, 1, 1]} : vector<8x16x32xf32> to vector<1x16x32xf32>
    %56 = vector.shape_cast %55 : vector<1x16x32xf32> to vector<16x32xf32>
    %57 = tpu.concatenate %50, %52, %54, %56 in 1 : vector<16x32xf32>, vector<16x32xf32>, vector<16x32xf32>, vector<16x32xf32> -> vector<16x128xf32>
    %c0_35 = arith.constant 0 : index
    %c0_36 = arith.constant 0 : index
    %58 = vector.load %arg4[%c0_35, %c0_36] : memref<256x128xbf16, #tpu.memory_space<vmem>>, vector<128x128xbf16>
    %59 = arith.truncf %57 : vector<16x128xf32> to vector<16x128xbf16>
    %cst_37 = arith.constant dense<0.000000e+00> : vector<16x128xf32>
    %60 = tpu.matmul %59, %58, %cst_37 {dimension_numbers = #tpu.dot_dimension_numbers<[1], [0], [0], [1], [0, 0, 1, 1], [], []>} : vector<16x128xbf16>, vector<128x128xbf16>, vector<16x128xf32> -> vector<16x128xf32>
    %61 = arith.addf %28, %60 : vector<16x128xf32>
    %62 = vector.extract_strided_slice %48 {offsets = [4, 0, 0], sizes = [1, 16, 32], strides = [1, 1, 1]} : vector<8x16x32xf32> to vector<1x16x32xf32>
    %63 = vector.shape_cast %62 : vector<1x16x32xf32> to vector<16x32xf32>
    %64 = vector.extract_strided_slice %48 {offsets = [5, 0, 0], sizes = [1, 16, 32], strides = [1, 1, 1]} : vector<8x16x32xf32> to vector<1x16x32xf32>
    %65 = vector.shape_cast %64 : vector<1x16x32xf32> to vector<16x32xf32>
    %66 = vector.extract_strided_slice %48 {offsets = [6, 0, 0], sizes = [1, 16, 32], strides = [1, 1, 1]} : vector<8x16x32xf32> to vector<1x16x32xf32>
    %67 = vector.shape_cast %66 : vector<1x16x32xf32> to vector<16x32xf32>
    %68 = vector.extract_strided_slice %48 {offsets = [7, 0, 0], sizes = [1, 16, 32], strides = [1, 1, 1]} : vector<8x16x32xf32> to vector<1x16x32xf32>
    %69 = vector.shape_cast %68 : vector<1x16x32xf32> to vector<16x32xf32>
    %70 = tpu.concatenate %63, %65, %67, %69 in 1 : vector<16x32xf32>, vector<16x32xf32>, vector<16x32xf32>, vector<16x32xf32> -> vector<16x128xf32>
    %c128 = arith.constant 128 : index
    %c0_38 = arith.constant 0 : index
    %71 = vector.load %arg4[%c128, %c0_38] : memref<256x128xbf16, #tpu.memory_space<vmem>>, vector<128x128xbf16>
    %72 = arith.truncf %70 : vector<16x128xf32> to vector<16x128xbf16>
    %cst_39 = arith.constant dense<0.000000e+00> : vector<16x128xf32>
    %73 = tpu.matmul %72, %71, %cst_39 {dimension_numbers = #tpu.dot_dimension_numbers<[1], [0], [0], [1], [0, 0, 1, 1], [], []>} : vector<16x128xbf16>, vector<128x128xbf16>, vector<16x128xf32> -> vector<16x128xf32>
    %74 = arith.addf %61, %73 : vector<16x128xf32>
    %cst_40 = arith.constant 0.000000e+00 : f32
    %75 = vector.broadcast %cst_40 : f32 to vector<16x128xf32>
    %76 = arith.maximumf %74, %75 : vector<16x128xf32>
    %77 = arith.truncf %76 : vector<16x128xf32> to vector<16x128xbf16>
    %c0_41 = arith.constant 0 : index
    %c0_42 = arith.constant 0 : index
    %78 = vector.load %arg5[%c0_41, %c0_42] : memref<128x128xbf16, #tpu.memory_space<vmem>>, vector<128x128xbf16>
    %cst_43 = arith.constant dense<0.000000e+00> : vector<16x128xf32>
    %79 = tpu.matmul %77, %78, %cst_43 {dimension_numbers = #tpu.dot_dimension_numbers<[1], [0], [0], [1], [0, 0, 1, 1], [], []>} : vector<16x128xbf16>, vector<128x128xbf16>, vector<16x128xf32> -> vector<16x128xf32>
    %80 = vector.broadcast %5 : vector<1x128xf32> to vector<16x128xf32>
    %81 = arith.addf %79, %80 : vector<16x128xf32>
    %c0_44 = arith.constant 0 : index
    %c0_45 = arith.constant 0 : index
    %82 = vector.load %arg7[%c0_44, %c0_45] : memref<16x128xf32, #tpu.memory_space<vmem>>, vector<16x128xf32>
    tpu.vector_store %arg7[%c0_44, %c0_45], %81 {strides = array<i32>} : memref<16x128xf32, #tpu.memory_space<vmem>>, vector<16x128xf32>,
    return
  }
  func.func @transform_0(%arg0: i32) -> (i32, i32, i32) {
    %c0_i32 = arith.constant 0 : i32
    %c0_i32_0 = arith.constant 0 : i32
    %c0_i32_1 = arith.constant 0 : i32
    return %c0_i32, %arg0, %c0_i32_0 : i32, i32, i32
  }
  func.func @transform_1(%arg0: i32) -> (i32, i32) {
    %c0_i32 = arith.constant 0 : i32
    %c0_i32_0 = arith.constant 0 : i32
    %c0_i32_1 = arith.constant 0 : i32
    return %c0_i32, %c0_i32_0 : i32, i32
  }
  func.func @transform_2(%arg0: i32) -> (i32, i32) {
    %c0_i32 = arith.constant 0 : i32
    %c0_i32_0 = arith.constant 0 : i32
    %c0_i32_1 = arith.constant 0 : i32
    return %c0_i32, %c0_i32_0 : i32, i32
  }
  func.func @transform_3(%arg0: i32) -> (i32, i32) {
    %c0_i32 = arith.constant 0 : i32
    %c0_i32_0 = arith.constant 0 : i32
    %c0_i32_1 = arith.constant 0 : i32
    return %c0_i32, %c0_i32_0 : i32, i32
  }
  func.func @transform_4(%arg0: i32) -> (i32, i32) {
    %c0_i32 = arith.constant 0 : i32
    %c0_i32_0 = arith.constant 0 : i32
    %c0_i32_1 = arith.constant 0 : i32
    return %c0_i32, %c0_i32_0 : i32, i32
  }
  func.func @transform_5(%arg0: i32) -> (i32, i32) {
    %c0_i32 = arith.constant 0 : i32
    %c0_i32_0 = arith.constant 0 : i32
    %c0_i32_1 = arith.constant 0 : i32
    return %c0_i32, %c0_i32_0 : i32, i32
  }
  func.func @transform_6(%arg0: i32) -> (i32, i32) {
    %c0_i32 = arith.constant 0 : i32
    %c0_i32_0 = arith.constant 0 : i32
    return %arg0, %c0_i32 : i32, i32
  }
}

</mosaic_0001>

<bundles_post_ra>
// kernel: tpu_custom_call.1
= control target key start
LH: loop header
LB: loop body
LE: loop exit
PB: predicated region body
PF: predicated region fallthrough
CT: control target
= control target key end

     0   :  { %vm370_vm0 = vcmask 1043456   ;;  %vm273_vm1 = vcmask 195584   ;;  %s3590_s0 = inlined_call_operand.vmem [shape: bf16[32,16,24], index: 0, kind: input, shape index: {}]   ;;  %s3591_s1 = inlined_call_operand.vmem [shape: bf16[24,16], index: 1, kind: input, shape index: {}]   ;;  %s3592_s2 = inlined_call_operand.vmem [shape: bf16[48,32], index: 2, kind: input, shape index: {}]   ;;  %s3593_s3 = inlined_call_operand.vmem [shape: bf16[256,128], index: 3, kind: input, shape index: {}]   ;;  %s3594_s4 = inlined_call_operand.vmem [shape: bf16[128,128], index: 4, kind: input, shape index: {}]   ;;  %s3595_s5 = inlined_call_operand.vmem [shape: f32[8,128], index: 5, kind: input, shape index: {}]   ;;  %s3596_s6 = inlined_call_operand.hbm [shape: f32[16,128], index: 6, kind: output, shape index: {}]  }
   0x1   :  { %v2695_v0 = vld [vmem:[%s3591_s1 + $0x8] ss:$0 sps:$4 sm:$0xff]   ;;  %v2696_v1 = vld [vmem:[%s3591_s1] sm:$0xff]   ;;  %v2699_v5 = vld [vmem:[%s3590_s0 + $0x10] sm:$0xff]  }
   0x2   :  { %2494 = vmatprep.subr.msk.bf16.mxu0 %vm370_vm0, %v2695_v0  ;;  %v372_v2 = vsel %vm370_vm0, %v2695_v0, 0  ;;  %v2697_v3 = vld [vmem:[%s3590_s0] sm:$0xff]   ;;  %2495 = vmatprep.subr.msk.bf16.mxu1 %vm370_vm0, %v2695_v0  ;;  %v2698_v4 = vld [vmem:[%s3590_s0 + $0x8] sm:$0xff]   ;;  %v2700_v6 = vld [vmem:[%s3590_s0 + $0x18] sm:$0xff]  }
   0x3   :  { %2325 = vmatpush3.bf16.msra.mxu0 %v372_v2  ;;  %2492 = vmatpush3.bf16.msra.mxu1 %v372_v2  ;;  %v2701_v7 = vld [vmem:[%s3590_s0 + $0x20] sm:$0xff]   ;;  %v2702_v8 = vld [vmem:[%s3590_s0 + $0x28] sm:$0xff]   ;;  %v2703_v9 = vld [vmem:[%s3590_s0 + $0x30] sm:$0xff]  }
   0x4   :  { %2326 = vmatprep.subr.bf16.mxu0 %v2696_v1  ;;  %2328 = vmatprep.mubr.msk.bf16.mxu0 %vm273_vm1, %v2697_v3  ;;  %v2723_v10 = vld [vmem:[%s3590_s0 + $0xe0] sm:$0xff]   ;;  %v2724_v11 = vld [vmem:[%s3590_s0 + $0xe8] sm:$0xff]   ;;  %v2704_v12 = vld [vmem:[%s3590_s0 + $0x38] sm:$0xff]  }
   0x5   :  { %2491 = vmatprep.subr.bf16.mxu1 %v2696_v1  ;;  %2384 = vmatprep.mubr.msk.bf16.mxu1 %vm273_vm1, %v2723_v10  ;;  %v2705_v13 = vld [vmem:[%s3590_s0 + $0x40] sm:$0xff]   ;;  %v2727_v14 = vld [vmem:[%s3590_s0 + $0xf0] sm:$0xff]   ;;  %v2728_v15 = vld [vmem:[%s3590_s0 + $0xf8] sm:$0xff]  }
   0x6   :  { %v2706_v16 = vld [vmem:[%s3590_s0 + $0x48] sm:$0xff]   ;;  %v2707_v17 = vld [vmem:[%s3590_s0 + $0x50] sm:$0xff]   ;;  %v2708_v18 = vld [vmem:[%s3590_s0 + $0x58] sm:$0xff]  }
   0x7   :  { %2327 = vmatpush3.bf16.msra.mxu0 %v2696_v1  ;;  %2493 = vmatpush3.bf16.msra.mxu1 %v2696_v1  ;;  %v2709_v19 = vld [vmem:[%s3590_s0 + $0x60] sm:$0xff]  }
   0xa   :  { %2329 = vmatmul.mubr.msk.bf16.vlgmr.msra.gmra.mxu0 %vm273_vm1, %v2698_v4  ;;  %2385 = vmatmul.mubr.msk.bf16.vlgmr.msra.gmra.mxu1 %vm273_vm1, %v2724_v11 }
   0xb   :  { %2332 = vmatprep.mubr.msk.bf16.mxu0 %vm273_vm1, %v2699_v5  ;;  %2388 = vmatprep.mubr.msk.bf16.mxu1 %vm273_vm1, %v2727_v14 }
  0x12   :  { %2333 = vmatmul.mubr.msk.bf16.gmra.mxu0 %vm273_vm1, %v2700_v6  ;;  %2389 = vmatmul.mubr.msk.bf16.gmra.mxu1 %vm273_vm1, %v2728_v15 }
  0x13   :  { %2336 = vmatprep.mubr.msk.bf16.mxu0 %vm273_vm1, %v2701_v7 }
  0x1a   :  { %2337 = vmatmul.mubr.msk.bf16.gmra.mxu0 %vm273_vm1, %v2702_v8 }
  0x1b   :  { %2340 = vmatprep.mubr.msk.bf16.mxu0 %vm273_vm1, %v2703_v9 }
  0x22   :  { %2341 = vmatmul.mubr.msk.bf16.gmra.mxu0 %vm273_vm1, %v2704_v12 }
  0x23   :  { %2344 = vmatprep.mubr.msk.bf16.mxu0 %vm273_vm1, %v2705_v13 }
  0x2a   :  { %2345 = vmatmul.mubr.msk.bf16.gmra.mxu0 %vm273_vm1, %v2706_v16 }
  0x2b   :  { %2348 = vmatprep.mubr.msk.bf16.mxu0 %vm273_vm1, %v2707_v17 }
  0x32   :  { %2349 = vmatmul.mubr.msk.bf16.gmra.mxu0 %vm273_vm1, %v2708_v18 }
  0x33   :  { %2352 = vmatprep.mubr.msk.bf16.mxu0 %vm273_vm1, %v2709_v19 }
  0x34   :  { %11 = vsyncpa [#allocation4], 0  ;;  %v2710_v20 = vld [vmem:[%s3590_s0 + $0x68] sm:$0xff]   ;;  %v2711_v21 = vld [vmem:[%s3590_s0 + $0x70] sm:$0xff]   ;;  %vm31_vm2 = vcmask 130048   ;;  %v2778_v42 = vmov 0.0  }
  0x35   :  { %v2712_v22 = vld [vmem:[%s3590_s0 + $0x78] sm:$0xff]   ;;  %v2713_v23 = vld [vmem:[%s3590_s0 + $0x80] sm:$0xff]   ;;  %v2714_v24 = vld [vmem:[%s3590_s0 + $0x88] sm:$0xff]   ;;  %32 = vst.msk [vmem:[#allocation2] sm:$0xff] %vm31_vm2, %v2778_v42  ;;  %2470 = vmatprep.subr.bf16.mxu0 %v2778_v42  ;;  %s2779_s21 = smov 16   ;;  %vm1318_vm3 = vcmask 261120  }
  0x36   :  { %v2715_v25 = vld [vmem:[%s3590_s0 + $0x90] sm:$0xff]   ;;  %v2716_v26 = vld [vmem:[%s3590_s0 + $0x98] sm:$0xff]   ;;  %v2717_v27 = vld [vmem:[%s3590_s0 + $0xa0] sm:$0xff]   ;;  %33 = vst.msk [vmem:[#allocation2 + $0x8] sm:$0xff] %vm31_vm2, %v2778_v42  ;;  %vm1391_vm4 = vcmask 392192   ;;  %s2781_s17 = smov 64  }
  0x37   :  { %v2718_v28 = vld [vmem:[%s3590_s0 + $0xa8] sm:$0xff]   ;;  %v2719_v29 = vld [vmem:[%s3590_s0 + $0xb0] sm:$0xff]   ;;  %v2720_v30 = vld [vmem:[%s3590_s0 + $0xb8] sm:$0xff]   ;;  %35 = vst.msk [vmem:[#allocation2 + $0x110] sm:$0xff] %vm31_vm2, %v2778_v42  ;;  %vm2782_vm5 = vmmov 0   ;;  %s2783_s19 = smov 96  }
  0x38   :  { %v2721_v31 = vld [vmem:[%s3590_s0 + $0xc0] sm:$0xff]   ;;  %v2722_v32 = vld [vmem:[%s3590_s0 + $0xc8] sm:$0xff]   ;;  %v2725_v33 = vld [vmem:[%s3590_s0 + $0xd0] sm:$0xff]   ;;  %36 = vst.msk [vmem:[#allocation2 + $0x118] sm:$0xff] %vm31_vm2, %v2778_v42  ;;  %vm1747_vm6 = vcmask 523264   ;;  %vm1750_vm7 = vcmask 785408  }
  0x39   :  { %v2726_v34 = vld [vmem:[%s3590_s0 + $0xd8] sm:$0xff]   ;;  %v2959_v35 = vld [vmem:[%s3595_s5] ss:$0 sm:$0xff]  ;;  %v2964_v36 = vld [vmem:[%s3595_s5 + $0x1] ss:$0 sm:$0xff]  ;;  %s2784_s26 = smov [#allocation3]  }
  0x3a   :  { %2353 = vmatmul.mubr.msk.bf16.gmra.mxu0 %vm273_vm1, %v2710_v20  ;;  %v2729_v14 = vld [vmem:[%s3592_s2 + $0x10] sm:$0xff]   ;;  %s2118_s27 = sshll.u32 %s2784_s26, 4  ;;  %s2119_s27 = int_to_ptr.vmem [resolvable:$true] %s2118_s27 }
  0x3b   :  { %2356 = vmatprep.mubr.msk.bf16.mxu0 %vm273_vm1, %v2711_v21  ;;  %2392 = vmatprep.subr.bf16.mxu1 %v2729_v14  ;;  %s2756_s28 = scalar_lea.vmem %s2119_s27, 256  ;;  %p2761_p1 = scmp.lt.s32.totalorder %s2119_s27, %s2119_s27 }
  0x3c   :  { %2393 = vmatpush3.bf16.msra.mxu1 %v2729_v14  ;;  %p2757_p0 = scmp.ne.s32.totalorder %s2119_s27, %s2756_s28  ;;  %p2762_p2 = scmp.lt.s32.totalorder %s2756_s28, %s2756_s28 }
  0x3e   :  { %p2763_p3 = por %p2762_p2, %p2761_p1 }
  0x40   :  { %p2764_p4 = pnand %p2763_p3, %p2757_p0 }
  0x42   :  { %2357 = vmatmul.mubr.msk.bf16.gmra.mxu0 %vm273_vm1, %v2712_v22 }
  0x43   :  { %2360 = vmatprep.mubr.msk.bf16.mxu0 %vm273_vm1, %v2713_v23 }
  0x4a   :  { %2361 = vmatmul.mubr.msk.bf16.gmra.mxu0 %vm273_vm1, %v2714_v24 }
  0x4b   :  { %2364 = vmatprep.mubr.msk.bf16.mxu0 %vm273_vm1, %v2715_v25 }
  0x52   :  { %2365 = vmatmul.mubr.msk.bf16.gmra.mxu0 %vm273_vm1, %v2716_v26 }
  0x53   :  { %2368 = vmatprep.mubr.msk.bf16.mxu0 %vm273_vm1, %v2717_v27 }
  0x5a   :  { %2369 = vmatmul.mubr.msk.bf16.gmra.mxu0 %vm273_vm1, %v2718_v28 }
  0x5b   :  { %2372 = vmatprep.mubr.msk.bf16.mxu0 %vm273_vm1, %v2719_v29 }
  0x62   :  { %2373 = vmatmul.mubr.msk.bf16.gmra.mxu0 %vm273_vm1, %v2720_v30  ;;  %v2730_v30 = vld [vmem:[%s3592_s2 + $0x8] sm:$0xff]  }
  0x63   :  { %2376 = vmatprep.mubr.msk.bf16.mxu0 %vm273_vm1, %v2721_v31  ;;  %2394 = vmatprep.subr.bf16.mxu1 %v2730_v30 }
  0x64   :  { %2395 = vmatpush3.bf16.msra.mxu1 %v2730_v30 }
  0x6a   :  { %2377 = vmatmul.mubr.msk.bf16.gmra.mxu0 %vm273_vm1, %v2722_v32 }
  0x6b   :  { %2380 = vmatprep.mubr.msk.bf16.mxu0 %vm273_vm1, %v2725_v33 }
  0x72   :  { %2381 = vmatmul.mubr.msk.bf16.gmra.mxu0 %vm273_vm1, %v2726_v34 }
  0x73   :  { %2486 = vmatprep.mubr.msk.bf16.mxu0 %vm2782_vm5, %v2778_v42 }
  0xca   :  { %v2330_v37 = vpop.f32.mrf.mxu0  ;;  %v2386_v19 = vpop.f32.mrf.mxu1 }
  0xcb   :  { %v669_v38 = vmul.f32 %v2330_v37, %v2959_v35  ;;  %v725_v24 = vmul.f32 %v2386_v19, %v2959_v35 }
  0xcc   :  { %v408_v39 = vpop.f32.mrf.mxu0  ;;  %v632_v29 = vpop.f32.mrf.mxu1 }
  0xcd   :  { %v737_v40 = vadd.f32 %v2964_v36, %v669_v38  ;;  %v667_v41 = vmul.f32 %v2959_v35, %v408_v39  ;;  %v793_v32 = vadd.f32 %v2964_v36, %v725_v24  ;;  %v723_v33 = vmul.f32 %v2959_v35, %v632_v29 }
  0xce   :  { %v2331_v43 = vpop.f32.mrf.mxu0  ;;  %v2387_v39 = vpop.f32.mrf.mxu1 }
  0xcf   :  { %v735_v44 = vadd.f32 %v2964_v36, %v667_v41  ;;  %v670_v45 = vmul.f32 %v2331_v43, %v2959_v35  ;;  %v801_v47 = vmax.f32 %v737_v40, 0.0  ;;  %v857_v41 = vmax.f32 %v793_v32, 0.0 }
  0xd0   :  { %v411_v46 = vpop.f32.mrf.mxu0  ;;  %v791_v43 = vadd.f32 %v2964_v36, %v723_v33 }
  0xd1   :  { %v799_v48 = vmax.f32 %v735_v44, 0.0  ;;  %v738_v49 = vadd.f32 %v2964_v36, %v670_v45  ;;  %v668_v50 = vmul.f32 %v2959_v35, %v411_v46  ;;  %v726_v44 = vmul.f32 %v2387_v39, %v2959_v35 }
  0xd2   :  { %v2334_v51 = vpop.f32.mrf.mxu0 }
  0xd3   :  { %v863_v52 = vmax.f32 %v799_v48, %v801_v47  ;;  %v736_v53 = vadd.f32 %v2964_v36, %v668_v50  ;;  %v673_v54 = vmul.f32 %v2334_v51, %v2959_v35  ;;  %v802_v56 = vmax.f32 %v738_v49, 0.0  ;;  %v635_v49 = vpop.f32.mrf.mxu1  ;;  %v2731_v50 = vld [vmem:[%s3592_s2] sm:$0xff]   ;;  %s2780_s2 = smov 32  }
  0xd4   :  { %v424_v55 = vpop.f32.mrf.mxu0  ;;  %2396 = vmatprep.subr.bf16.mxu1 %v2731_v50 }
  0xd5   :  { %896 = vst.msk [vmem:[#allocation2 + $0x10] sm:$0xff] %vm31_vm2, %v863_v52  ;;  %v800_v57 = vmax.f32 %v736_v53, 0.0  ;;  %v741_v58 = vadd.f32 %v2964_v36, %v673_v54  ;;  %v671_v59 = vmul.f32 %v2959_v35, %v424_v55  ;;  %v855_v52 = vmax.f32 %v791_v43, 0.0  ;;  %2397 = vmatpush3.bf16.msra.mxu1 %v2731_v50 }
  0xd6   :  { %v2335_v60 = vpop.f32.mrf.mxu0  ;;  %v794_v53 = vadd.f32 %v2964_v36, %v726_v44  ;;  %v724_v54 = vmul.f32 %v2959_v35, %v635_v49  ;;  %2430 = vmatprep.subr.bf16.mxu1 %v2778_v42 }
  0xd7   :  { %v864_v61 = vmax.f32 %v800_v57, %v802_v56  ;;  %v739_v62 = vadd.f32 %v2964_v36, %v671_v59  ;;  %v674_v63 = vmul.f32 %v2335_v60, %v2959_v35  ;;  %v805_v1 = vmax.f32 %v741_v58, 0.0  ;;  %v2390_v59 = vpop.f32.mrf.mxu1 }
  0xd8   :  { %v427_v0 = vpop.f32.mrf.mxu0 }
  0xd9   :  { %897 = vst.msk [vmem:[#allocation2 + $0x18] sm:$0xff] %vm31_vm2, %v864_v61  ;;  %v803_v2 = vmax.f32 %v739_v62, 0.0  ;;  %v742_v3 = vadd.f32 %v2964_v36, %v674_v63  ;;  %v672_v4 = vmul.f32 %v2959_v35, %v427_v0  ;;  %v891_v63 = vmax.f32 %v855_v52, %v857_v41 }
  0xda   :  { %v2338_v5 = vpop.f32.mrf.mxu0  ;;  %v858_v0 = vmax.f32 %v794_v53, 0.0 }
  0xdb   :  { %v865_v6 = vmax.f32 %v803_v2, %v805_v1  ;;  %v740_v7 = vadd.f32 %v2964_v36, %v672_v4  ;;  %v677_v8 = vmul.f32 %v2338_v5, %v2959_v35  ;;  %v806_v10 = vmax.f32 %v742_v3, 0.0  ;;  %924 = vst.msk [vmem:[#allocation2 + $0xf0] sm:$0xff] %vm31_vm2, %v891_v63 }
  0xdc   :  { %v440_v9 = vpop.f32.mrf.mxu0  ;;  %v3002_v22 = vld [vmem:[#allocation2 + $0x10] sm:$0xff]  ;;  %v792_v1 = vadd.f32 %v2964_v36, %v724_v54  ;;  %v729_v2 = vmul.f32 %v2390_v59, %v2959_v35 }
  0xdd   :  { %898 = vst.msk [vmem:[#allocation2 + $0x20] sm:$0xff] %vm31_vm2, %v865_v6  ;;  %v804_v11 = vmax.f32 %v740_v7, 0.0  ;;  %v745_v12 = vadd.f32 %v2964_v36, %v677_v8  ;;  %v675_v13 = vmul.f32 %v2959_v35, %v440_v9  ;;  %v648_v7 = vpop.f32.mrf.mxu1 }
  0xde   :  { %v2339_v15 = vpop.f32.mrf.mxu0  ;;  %v856_v9 = vmax.f32 %v792_v1, 0.0 }
  0xdf   :  { %v866_v16 = vmax.f32 %v804_v11, %v806_v10  ;;  %v743_v17 = vadd.f32 %v2964_v36, %v675_v13  ;;  %v678_v18 = vmul.f32 %v2339_v15, %v2959_v35  ;;  %v809_v20 = vmax.f32 %v745_v12, 0.0  ;;  %v2391_v15 = vpop.f32.mrf.mxu1 }
  0xe0   :  { %v443_v21 = vpop.f32.mrf.mxu0  ;;  %v3004_v23 = vld [vmem:[#allocation2 + $0x18] sm:$0xff]  ;;  %v797_v10 = vadd.f32 %v2964_v36, %v729_v2  ;;  %v727_v11 = vmul.f32 %v2959_v35, %v648_v7 }
  0xe1   :  { %899 = vst.msk [vmem:[#allocation2 + $0x28] sm:$0xff] %vm31_vm2, %v866_v16  ;;  %v807_v25 = vmax.f32 %v743_v17, 0.0  ;;  %v746_v26 = vadd.f32 %v2964_v36, %v678_v18  ;;  %v676_v27 = vmul.f32 %v2959_v35, %v443_v21  ;;  %v2505_v28 = vpack.i.bf16 %v3004_v23, %v3002_v22 }
  0xe2   :  { %v2342_v31 = vpop.f32.mrf.mxu0  ;;  %v892_v17 = vmax.f32 %v856_v9, %v858_v0  ;;  %v861_v18 = vmax.f32 %v797_v10, 0.0  ;;  %v795_v19 = vadd.f32 %v2964_v36, %v727_v11 }
  0xe3   :  { %v867_v34 = vmax.f32 %v807_v25, %v809_v20  ;;  %v744_v37 = vadd.f32 %v2964_v36, %v676_v27  ;;  %v681_v38 = vmul.f32 %v2342_v31, %v2959_v35  ;;  %2506 = vrot.lane.b32.xlu0 %v2505_v28, %s2779_s21  ;;  %v810_v45 = vmax.f32 %v746_v26, 0.0  ;;  %v651_v27 = vpop.f32.mrf.mxu1 }
  0xe4   :  { %v456_v40 = vpop.f32.mrf.mxu0  ;;  %v3032_v61 = vld [vmem:[#allocation2 + $0x20] sm:$0xff]  ;;  %v730_v20 = vmul.f32 %v2391_v15, %v2959_v35  ;;  %925 = vst.msk [vmem:[#allocation2 + $0xf8] sm:$0xff] %vm31_vm2, %v892_v17  ;;  %v859_v29 = vmax.f32 %v795_v19, 0.0  ;;  %v728_v31 = vmul.f32 %v2959_v35, %v651_v27 }
  0xe5   :  { %900 = vst.msk [vmem:[#allocation2 + $0x30] sm:$0xff] %vm31_vm2, %v867_v34  ;;  %v808_v46 = vmax.f32 %v744_v37, 0.0  ;;  %v749_v47 = vadd.f32 %v2964_v36, %v681_v38  ;;  %v679_v48 = vmul.f32 %v2959_v35, %v456_v40 }
  0xe6   :  { %v2343_v51 = vpop.f32.mrf.mxu0  ;;  %v798_v30 = vadd.f32 %v2964_v36, %v730_v20  ;;  %v893_v41 = vmax.f32 %v859_v29, %v861_v18  ;;  %v796_v44 = vadd.f32 %v2964_v36, %v728_v31 }
  0xe7   :  { %v868_v55 = vmax.f32 %v808_v46, %v810_v45  ;;  %v813_v56 = vmax.f32 %v749_v47, 0.0  ;;  %v747_v57 = vadd.f32 %v2964_v36, %v679_v48  ;;  %v682_v58 = vmul.f32 %v2343_v51, %v2959_v35 }
  0xe8   :  { %v459_v60 = vpop.f32.mrf.mxu0  ;;  %v3034_v62 = vld [vmem:[#allocation2 + $0x28] sm:$0xff]  ;;  %v862_v43 = vmax.f32 %v798_v30, 0.0  ;;  %926 = vst.msk [vmem:[#allocation2 + $0x100] sm:$0xff] %vm31_vm2, %v893_v41  ;;  %v860_v50 = vmax.f32 %v796_v44, 0.0 }
  0xe9   :  { %901 = vst.msk [vmem:[#allocation2 + $0x38] sm:$0xff] %vm31_vm2, %v868_v55  ;;  %v811_v3 = vmax.f32 %v747_v57, 0.0  ;;  %v750_v4 = vadd.f32 %v2964_v36, %v682_v58  ;;  %v680_v5 = vmul.f32 %v2959_v35, %v459_v60  ;;  %v2515_v6 = vpack.i.bf16 %v3034_v62, %v3032_v61 }
  0xea   :  { %v2346_v8 = vpop.f32.mrf.mxu0  ;;  %v894_v55 = vmax.f32 %v860_v50, %v862_v43 }
  0xeb   :  { %v869_v12 = vmax.f32 %v811_v3, %v813_v56  ;;  %v748_v13 = vadd.f32 %v2964_v36, %v680_v5  ;;  %v685_v14 = vmul.f32 %v2346_v8, %v2959_v35  ;;  %2516 = vrot.lane.b32.xlu1 %v2515_v6, %s2780_s2  ;;  %2511 = vrot.lane.b32.xlu0 %v2515_v6, %s2779_s21  ;;  %v814_v21 = vmax.f32 %v750_v4, 0.0 }
  0xec   :  { %v472_v16 = vpop.f32.mrf.mxu0  ;;  %v3061_v39 = vld [vmem:[#allocation2 + $0x30] sm:$0xff]  ;;  %927 = vst.msk [vmem:[#allocation2 + $0x108] sm:$0xff] %vm31_vm2, %v894_v55 }
  0xed   :  { %902 = vst.msk [vmem:[#allocation2 + $0x40] sm:$0xff] %vm31_vm2, %v869_v12  ;;  %v812_v24 = vmax.f32 %v748_v13, 0.0  ;;  %v753_v25 = vadd.f32 %v2964_v36, %v685_v14  ;;  %v683_v26 = vmul.f32 %v2959_v35, %v472_v16 }
  0xee   :  { %v2347_v28 = vpop.f32.mrf.mxu0 }
  0xef   :  { %v870_v32 = vmax.f32 %v812_v24, %v814_v21  ;;  %v751_v33 = vadd.f32 %v2964_v36, %v683_v26  ;;  %v686_v34 = vmul.f32 %v2347_v28, %v2959_v35  ;;  %v817_v37 = vmax.f32 %v753_v25, 0.0 }
  0xf0   :  { %v475_v38 = vpop.f32.mrf.mxu0  ;;  %v3063_v40 = vld [vmem:[#allocation2 + $0x38] sm:$0xff] }
  0xf1   :  { %903 = vst.msk [vmem:[#allocation2 + $0x48] sm:$0xff] %vm31_vm2, %v870_v32  ;;  %v815_v45 = vmax.f32 %v751_v33, 0.0  ;;  %v754_v46 = vadd.f32 %v2964_v36, %v686_v34  ;;  %v684_v47 = vmul.f32 %v2959_v35, %v475_v38  ;;  %v2520_v48 = vpack.i.bf16 %v3063_v40, %v3061_v39 }
  0xf2   :  { %v2350_v49 = vpop.f32.mrf.mxu0 }
  0xf3   :  { %v871_v51 = vmax.f32 %v815_v45, %v817_v37  ;;  %v752_v52 = vadd.f32 %v2964_v36, %v684_v47  ;;  %v689_v53 = vmul.f32 %v2350_v49, %v2959_v35  ;;  %2521 = vrot.lane.b32.xlu1 %v2520_v48, %s2780_s2  ;;  %2526 = vrot.lane.b32.xlu0 %v2520_v48, %s2779_s21  ;;  %v818_v56 = vmax.f32 %v754_v46, 0.0 }
  0xf4   :  { %v488_v54 = vpop.f32.mrf.mxu0  ;;  %v3082_v4 = vld [vmem:[#allocation2 + $0x40] sm:$0xff] }
  0xf5   :  { %904 = vst.msk [vmem:[#allocation2 + $0x50] sm:$0xff] %vm31_vm2, %v871_v51  ;;  %v816_v57 = vmax.f32 %v752_v52, 0.0  ;;  %v757_v58 = vadd.f32 %v2964_v36, %v689_v53  ;;  %v687_v59 = vmul.f32 %v2959_v35, %v488_v54 }
  0xf6   :  { %v2351_v60 = vpop.f32.mrf.mxu0 }
  0xf7   :  { %v872_v63 = vmax.f32 %v816_v57, %v818_v56  ;;  %v755_v0 = vadd.f32 %v2964_v36, %v687_v59  ;;  %v690_v1 = vmul.f32 %v2351_v60, %v2959_v35  ;;  %v821_v2 = vmax.f32 %v757_v58, 0.0 }
  0xf8   :  { %v491_v3 = vpop.f32.mrf.mxu0  ;;  %v3084_v5 = vld [vmem:[#allocation2 + $0x48] sm:$0xff] }
  0xf9   :  { %905 = vst.msk [vmem:[#allocation2 + $0x58] sm:$0xff] %vm31_vm2, %v872_v63  ;;  %v819_v6 = vmax.f32 %v755_v0, 0.0  ;;  %v758_v7 = vadd.f32 %v2964_v36, %v690_v1  ;;  %v688_v8 = vmul.f32 %v2959_v35, %v491_v3  ;;  %v2530_v9 = vpack.i.bf16 %v3084_v5, %v3082_v4 }
  0xfa   :  { %v2354_v10 = vpop.f32.mrf.mxu0 }
  0xfb   :  { %v873_v11 = vmax.f32 %v819_v6, %v821_v2  ;;  %v756_v12 = vadd.f32 %v2964_v36, %v688_v8  ;;  %v693_v13 = vmul.f32 %v2354_v10, %v2959_v35  ;;  %2531 = vrot.lane.b32.xlu1 %v2530_v9, %s2779_s21  ;;  %2536 = vrot.lane.b32.xlu0 %v2530_v9, %s2780_s2  ;;  %v822_v15 = vmax.f32 %v758_v7, 0.0 }
  0xfc   :  { %v504_v14 = vpop.f32.mrf.mxu0  ;;  %v3100_v27 = vld [vmem:[#allocation2 + $0x50] sm:$0xff] }
  0xfd   :  { %906 = vst.msk [vmem:[#allocation2 + $0x60] sm:$0xff] %vm31_vm2, %v873_v11  ;;  %v820_v16 = vmax.f32 %v756_v12, 0.0  ;;  %v761_v17 = vadd.f32 %v2964_v36, %v693_v13  ;;  %v691_v18 = vmul.f32 %v2959_v35, %v504_v14 }
  0xfe   :  { %v2355_v19 = vpop.f32.mrf.mxu0 }
  0xff   :  { %v874_v20 = vmax.f32 %v820_v16, %v822_v15  ;;  %v759_v21 = vadd.f32 %v2964_v36, %v691_v18  ;;  %v694_v24 = vmul.f32 %v2355_v19, %v2959_v35  ;;  %v825_v25 = vmax.f32 %v761_v17, 0.0 }
 0x100   :  { %v507_v26 = vpop.f32.mrf.mxu0  ;;  %v3102_v28 = vld [vmem:[#allocation2 + $0x58] sm:$0xff] }
 0x101   :  { %907 = vst.msk [vmem:[#allocation2 + $0x68] sm:$0xff] %vm31_vm2, %v874_v20  ;;  %v823_v29 = vmax.f32 %v759_v21, 0.0  ;;  %v762_v30 = vadd.f32 %v2964_v36, %v694_v24  ;;  %v692_v31 = vmul.f32 %v2959_v35, %v507_v26  ;;  %v2540_v32 = vpack.i.bf16 %v3102_v28, %v3100_v27 }
 0x102   :  { %v2358_v33 = vpop.f32.mrf.mxu0 }
 0x103   :  { %v875_v34 = vmax.f32 %v823_v29, %v825_v25  ;;  %v760_v37 = vadd.f32 %v2964_v36, %v692_v31  ;;  %v697_v38 = vmul.f32 %v2358_v33, %v2959_v35  ;;  %2541 = vrot.lane.b32.xlu1 %v2540_v32, %s2780_s2  ;;  %2546 = vrot.lane.b32.xlu0 %v2540_v32, %s2779_s21  ;;  %v826_v43 = vmax.f32 %v762_v30, 0.0 }
 0x104   :  { %v520_v41 = vpop.f32.mrf.mxu0  ;;  %v3118_v53 = vld [vmem:[#allocation2 + $0x60] sm:$0xff] }
 0x105   :  { %908 = vst.msk [vmem:[#allocation2 + $0x70] sm:$0xff] %vm31_vm2, %v875_v34  ;;  %v824_v44 = vmax.f32 %v760_v37, 0.0  ;;  %v765_v45 = vadd.f32 %v2964_v36, %v697_v38  ;;  %v695_v46 = vmul.f32 %v2959_v35, %v520_v41 }
 0x106   :  { %v2359_v47 = vpop.f32.mrf.mxu0 }
 0x107   :  { %v876_v48 = vmax.f32 %v824_v44, %v826_v43  ;;  %v763_v49 = vadd.f32 %v2964_v36, %v695_v46  ;;  %v698_v50 = vmul.f32 %v2359_v47, %v2959_v35  ;;  %v829_v51 = vmax.f32 %v765_v45, 0.0 }
 0x108   :  { %v523_v52 = vpop.f32.mrf.mxu0  ;;  %v3120_v54 = vld [vmem:[#allocation2 + $0x68] sm:$0xff] }
 0x109   :  { %909 = vst.msk [vmem:[#allocation2 + $0x78] sm:$0xff] %vm31_vm2, %v876_v48  ;;  %v827_v55 = vmax.f32 %v763_v49, 0.0  ;;  %v766_v56 = vadd.f32 %v2964_v36, %v698_v50  ;;  %v696_v57 = vmul.f32 %v2959_v35, %v523_v52  ;;  %v2550_v58 = vpack.i.bf16 %v3120_v54, %v3118_v53 }
 0x10a   :  { %v2362_v59 = vpop.f32.mrf.mxu0 }
 0x10b   :  { %v877_v60 = vmax.f32 %v827_v55, %v829_v51  ;;  %v764_v63 = vadd.f32 %v2964_v36, %v696_v57  ;;  %v701_v0 = vmul.f32 %v2362_v59, %v2959_v35  ;;  %2551 = vrot.lane.b32.xlu1 %v2550_v58, %s2779_s21  ;;  %2556 = vrot.lane.b32.xlu0 %v2550_v58, %s2780_s2  ;;  %v830_v2 = vmax.f32 %v766_v56, 0.0 }
 0x10c   :  { %v536_v1 = vpop.f32.mrf.mxu0  ;;  %v3136_v14 = vld [vmem:[#allocation2 + $0x70] sm:$0xff] }
 0x10d   :  { %910 = vst.msk [vmem:[#allocation2 + $0x80] sm:$0xff] %vm31_vm2, %v877_v60  ;;  %v828_v3 = vmax.f32 %v764_v63, 0.0  ;;  %v769_v6 = vadd.f32 %v2964_v36, %v701_v0  ;;  %v699_v7 = vmul.f32 %v2959_v35, %v536_v1 }
 0x10e   :  { %v2363_v8 = vpop.f32.mrf.mxu0 }
 0x10f   :  { %v878_v9 = vmax.f32 %v828_v3, %v830_v2  ;;  %v767_v10 = vadd.f32 %v2964_v36, %v699_v7  ;;  %v702_v11 = vmul.f32 %v2363_v8, %v2959_v35  ;;  %v833_v12 = vmax.f32 %v769_v6, 0.0 }
 0x110   :  { %v539_v13 = vpop.f32.mrf.mxu0  ;;  %v3138_v15 = vld [vmem:[#allocation2 + $0x78] sm:$0xff] }
 0x111   :  { %911 = vst.msk [vmem:[#allocation2 + $0x88] sm:$0xff] %vm31_vm2, %v878_v9  ;;  %v831_v16 = vmax.f32 %v767_v10, 0.0  ;;  %v770_v17 = vadd.f32 %v2964_v36, %v702_v11  ;;  %v700_v18 = vmul.f32 %v2959_v35, %v539_v13  ;;  %v2560_v19 = vpack.i.bf16 %v3138_v15, %v3136_v14 }
 0x112   :  { %v2366_v20 = vpop.f32.mrf.mxu0 }
 0x113   :  { %v879_v21 = vmax.f32 %v831_v16, %v833_v12  ;;  %v768_v24 = vadd.f32 %v2964_v36, %v700_v18  ;;  %v705_v25 = vmul.f32 %v2366_v20, %v2959_v35  ;;  %2561 = vrot.lane.b32.xlu1 %v2560_v19, %s2780_s2  ;;  %2566 = vrot.lane.b32.xlu0 %v2560_v19, %s2779_s21  ;;  %v834_v29 = vmax.f32 %v770_v17, 0.0 }
 0x114   :  { %v552_v26 = vpop.f32.mrf.mxu0  ;;  %v3154_v44 = vld [vmem:[#allocation2 + $0x80] sm:$0xff] }
 0x115   :  { %912 = vst.msk [vmem:[#allocation2 + $0x90] sm:$0xff] %vm31_vm2, %v879_v21  ;;  %v832_v30 = vmax.f32 %v768_v24, 0.0  ;;  %v773_v31 = vadd.f32 %v2964_v36, %v705_v25  ;;  %v703_v32 = vmul.f32 %v2959_v35, %v552_v26 }
 0x116   :  { %v2367_v33 = vpop.f32.mrf.mxu0 }
 0x117   :  { %v880_v34 = vmax.f32 %v832_v30, %v834_v29  ;;  %v771_v37 = vadd.f32 %v2964_v36, %v703_v32  ;;  %v706_v38 = vmul.f32 %v2367_v33, %v2959_v35  ;;  %v837_v41 = vmax.f32 %v773_v31, 0.0 }
 0x118   :  { %v555_v43 = vpop.f32.mrf.mxu0  ;;  %v3156_v45 = vld [vmem:[#allocation2 + $0x88] sm:$0xff] }
 0x119   :  { %913 = vst.msk [vmem:[#allocation2 + $0x98] sm:$0xff] %vm31_vm2, %v880_v34  ;;  %v835_v46 = vmax.f32 %v771_v37, 0.0  ;;  %v774_v47 = vadd.f32 %v2964_v36, %v706_v38  ;;  %v704_v48 = vmul.f32 %v2959_v35, %v555_v43  ;;  %v2570_v49 = vpack.i.bf16 %v3156_v45, %v3154_v44 }
 0x11a   :  { %v2370_v50 = vpop.f32.mrf.mxu0 }
 0x11b   :  { %v881_v51 = vmax.f32 %v835_v46, %v837_v41  ;;  %v772_v52 = vadd.f32 %v2964_v36, %v704_v48  ;;  %v709_v55 = vmul.f32 %v2370_v50, %v2959_v35  ;;  %2571 = vrot.lane.b32.xlu1 %v2570_v49, %s2779_s21  ;;  %2576 = vrot.lane.b32.xlu0 %v2570_v49, %s2780_s2  ;;  %v838_v57 = vmax.f32 %v774_v47, 0.0 }
 0x11c   :  { %v568_v56 = vpop.f32.mrf.mxu0  ;;  %v3172_v7 = vld [vmem:[#allocation2 + $0x90] sm:$0xff] }
 0x11d   :  { %914 = vst.msk [vmem:[#allocation2 + $0xa0] sm:$0xff] %vm31_vm2, %v881_v51  ;;  %v836_v58 = vmax.f32 %v772_v52, 0.0  ;;  %v777_v59 = vadd.f32 %v2964_v36, %v709_v55  ;;  %v707_v60 = vmul.f32 %v2959_v35, %v568_v56 }
 0x11e   :  { %v2371_v63 = vpop.f32.mrf.mxu0 }
 0x11f   :  { %v882_v0 = vmax.f32 %v836_v58, %v838_v57  ;;  %v775_v1 = vadd.f32 %v2964_v36, %v707_v60  ;;  %v710_v2 = vmul.f32 %v2371_v63, %v2959_v35  ;;  %v841_v3 = vmax.f32 %v777_v59, 0.0 }
 0x120   :  { %v571_v6 = vpop.f32.mrf.mxu0  ;;  %v3174_v8 = vld [vmem:[#allocation2 + $0x98] sm:$0xff] }
 0x121   :  { %915 = vst.msk [vmem:[#allocation2 + $0xa8] sm:$0xff] %vm31_vm2, %v882_v0  ;;  %v839_v9 = vmax.f32 %v775_v1, 0.0  ;;  %v778_v10 = vadd.f32 %v2964_v36, %v710_v2  ;;  %v708_v11 = vmul.f32 %v2959_v35, %v571_v6  ;;  %v2580_v12 = vpack.i.bf16 %v3174_v8, %v3172_v7 }
 0x122   :  { %v2374_v13 = vpop.f32.mrf.mxu0 }
 0x123   :  { %v883_v16 = vmax.f32 %v839_v9, %v841_v3  ;;  %v776_v17 = vadd.f32 %v2964_v36, %v708_v11  ;;  %v713_v18 = vmul.f32 %v2374_v13, %v2959_v35  ;;  %2581 = vrot.lane.b32.xlu1 %v2580_v12, %s2780_s2  ;;  %2586 = vrot.lane.b32.xlu0 %v2580_v12, %s2779_s21  ;;  %v842_v20 = vmax.f32 %v778_v10, 0.0 }
 0x124   :  { %v584_v19 = vpop.f32.mrf.mxu0  ;;  %v3190_v34 = vld [vmem:[#allocation2 + $0xa0] sm:$0xff] }
 0x125   :  { %916 = vst.msk [vmem:[#allocation2 + $0xb0] sm:$0xff] %vm31_vm2, %v883_v16  ;;  %v840_v21 = vmax.f32 %v776_v17, 0.0  ;;  %v781_v24 = vadd.f32 %v2964_v36, %v713_v18  ;;  %v711_v25 = vmul.f32 %v2959_v35, %v584_v19 }
 0x126   :  { %v2375_v26 = vpop.f32.mrf.mxu0 }
 0x127   :  { %v884_v29 = vmax.f32 %v840_v21, %v842_v20  ;;  %v779_v30 = vadd.f32 %v2964_v36, %v711_v25  ;;  %v714_v31 = vmul.f32 %v2375_v26, %v2959_v35  ;;  %v845_v32 = vmax.f32 %v781_v24, 0.0 }
 0x128   :  { %v587_v33 = vpop.f32.mrf.mxu0  ;;  %v3192_v37 = vld [vmem:[#allocation2 + $0xa8] sm:$0xff] }
 0x129   :  { %917 = vst.msk [vmem:[#allocation2 + $0xb8] sm:$0xff] %vm31_vm2, %v884_v29  ;;  %v843_v38 = vmax.f32 %v779_v30, 0.0  ;;  %v782_v41 = vadd.f32 %v2964_v36, %v714_v31  ;;  %v712_v43 = vmul.f32 %v2959_v35, %v587_v33  ;;  %v2590_v46 = vpack.i.bf16 %v3192_v37, %v3190_v34 }
 0x12a   :  { %v2378_v47 = vpop.f32.mrf.mxu0 }
 0x12b   :  { %v885_v48 = vmax.f32 %v843_v38, %v845_v32  ;;  %v780_v49 = vadd.f32 %v2964_v36, %v712_v43  ;;  %v717_v50 = vmul.f32 %v2378_v47, %v2959_v35  ;;  %2591 = vrot.lane.b32.xlu1 %v2590_v46, %s2779_s21  ;;  %2596 = vrot.lane.b32.xlu0 %v2590_v46, %s2780_s2  ;;  %v846_v52 = vmax.f32 %v782_v41, 0.0 }
 0x12c   :  { %v600_v51 = vpop.f32.mrf.mxu0  ;;  %v3208_v2 = vld [vmem:[#allocation2 + $0xb0] sm:$0xff] }
 0x12d   :  { %918 = vst.msk [vmem:[#allocation2 + $0xc0] sm:$0xff] %vm31_vm2, %v885_v48  ;;  %v844_v55 = vmax.f32 %v780_v49, 0.0  ;;  %v785_v56 = vadd.f32 %v2964_v36, %v717_v50  ;;  %v715_v57 = vmul.f32 %v2959_v35, %v600_v51 }
 0x12e   :  { %v2379_v58 = vpop.f32.mrf.mxu0 }
 0x12f   :  { %v886_v59 = vmax.f32 %v844_v55, %v846_v52  ;;  %v783_v60 = vadd.f32 %v2964_v36, %v715_v57  ;;  %v718_v63 = vmul.f32 %v2379_v58, %v2959_v35  ;;  %v849_v0 = vmax.f32 %v785_v56, 0.0 }
 0x130   :  { %v603_v1 = vpop.f32.mrf.mxu0  ;;  %v3210_v3 = vld [vmem:[#allocation2 + $0xb8] sm:$0xff] }
 0x131   :  { %919 = vst.msk [vmem:[#allocation2 + $0xc8] sm:$0xff] %vm31_vm2, %v886_v59  ;;  %v847_v6 = vmax.f32 %v783_v60, 0.0  ;;  %v786_v9 = vadd.f32 %v2964_v36, %v718_v63  ;;  %v716_v10 = vmul.f32 %v2959_v35, %v603_v1  ;;  %v2600_v11 = vpack.i.bf16 %v3210_v3, %v3208_v2  ;;  %v3254_v59 = vld [vmem:[#allocation2 + $0xf0] sm:$0xff]  ;;  %v3256_v60 = vld [vmem:[#allocation2 + $0xf8] sm:$0xff]  ;;  %v996_v1 = vld [vmem:[#allocation2 + $0x108] sm:$0xff] }
 0x132   :  { %v2382_v12 = vpop.f32.mrf.mxu0  ;;  %v2635_v63 = vpack.i.bf16 %v3256_v60, %v3254_v59 }
 0x133   :  { %v887_v13 = vmax.f32 %v847_v6, %v849_v0  ;;  %v784_v16 = vadd.f32 %v2964_v36, %v716_v10  ;;  %v721_v17 = vmul.f32 %v2382_v12, %v2959_v35  ;;  %2601 = vrot.lane.b32.xlu1 %v2600_v11, %s2780_s2  ;;  %2606 = vrot.lane.b32.xlu0 %v2600_v11, %s2779_s21  ;;  %v850_v19 = vmax.f32 %v786_v9, 0.0  ;;  %v995_v0 = vld [vmem:[#allocation2 + $0x100] sm:$0xff]  ;;  %v1028_v6 = vld [vmem:[#allocation2 + $0x110] sm:$0xff]  ;;  %v1029_v9 = vld [vmem:[#allocation2 + $0x118] sm:$0xff] }
 0x134   :  { %v616_v18 = vpop.f32.mrf.mxu0  ;;  %v3226_v33 = vld [vmem:[#allocation2 + $0xc0] sm:$0xff]  ;;  %v2650_v10 = vpack.i.bf16 %v996_v1, %v995_v0  ;;  %v2660_v11 = vpack.i.bf16 %v1029_v9, %v1028_v6 }
 0x135   :  { %920 = vst.msk [vmem:[#allocation2 + $0xd0] sm:$0xff] %vm31_vm2, %v887_v13  ;;  %v848_v20 = vmax.f32 %v784_v16, 0.0  ;;  %v789_v21 = vadd.f32 %v2964_v36, %v721_v17  ;;  %v719_v24 = vmul.f32 %v2959_v35, %v616_v18  ;;  %v933_v17 = vld [vmem:[#allocation2] sm:$0xff]  ;;  %v934_v18 = vld [vmem:[#allocation2 + $0x8] sm:$0xff] }
 0x136   :  { %v2383_v25 = vpop.f32.mrf.mxu0 }
 0x137   :  { %v888_v26 = vmax.f32 %v848_v20, %v850_v19  ;;  %v787_v29 = vadd.f32 %v2964_v36, %v719_v24  ;;  %v722_v30 = vmul.f32 %v2383_v25, %v2959_v35  ;;  %v853_v31 = vmax.f32 %v789_v21, 0.0 }
 0x138   :  { %v619_v32 = vpop.f32.mrf.mxu0  ;;  %v3228_v38 = vld [vmem:[#allocation2 + $0xc8] sm:$0xff] }
 0x139   :  { %921 = vst.msk [vmem:[#allocation2 + $0xd8] sm:$0xff] %vm31_vm2, %v888_v26  ;;  %v851_v41 = vmax.f32 %v787_v29, 0.0  ;;  %v790_v43 = vadd.f32 %v2964_v36, %v722_v30  ;;  %v720_v46 = vmul.f32 %v2959_v35, %v619_v32  ;;  %v2610_v47 = vpack.i.bf16 %v3228_v38, %v3226_v33 }
 0x13b   :  { %v889_v48 = vmax.f32 %v851_v41, %v853_v31  ;;  %v788_v49 = vadd.f32 %v2964_v36, %v720_v46  ;;  %2611 = vrot.lane.b32.xlu1 %v2610_v47, %s2779_s21  ;;  %2616 = vrot.lane.b32.xlu0 %v2610_v47, %s2780_s2  ;;  %v854_v50 = vmax.f32 %v790_v43, 0.0 }
 0x13c   :  { %v3239_v55 = vld [vmem:[#allocation2 + $0xd0] sm:$0xff] }
 0x13d   :  { %922 = vst.msk [vmem:[#allocation2 + $0xe0] sm:$0xff] %vm31_vm2, %v889_v48  ;;  %v852_v51 = vmax.f32 %v788_v49, 0.0 }
 0x13f   :  { %v890_v52 = vmax.f32 %v852_v51, %v854_v50 }
 0x140   :  { %v3241_v56 = vld [vmem:[#allocation2 + $0xd8] sm:$0xff] }
 0x141   :  { %923 = vst.msk [vmem:[#allocation2 + $0xe8] sm:$0xff] %vm31_vm2, %v890_v52  ;;  %v2620_v35 = vpack.i.bf16 %v3241_v56, %v3239_v55 }
 0x143   :  { %2621 = vrot.lane.b32.xlu1 %v2620_v35, %s2780_s2  ;;  %2626 = vrot.lane.b32.xlu0 %v2620_v35, %s2779_s21 }
 0x144   :  { %v3248_v36 = vld [vmem:[#allocation2 + $0xe0] sm:$0xff] }
 0x148   :  { %v3250_v57 = vld [vmem:[#allocation2 + $0xe8] sm:$0xff] }
 0x149   :  { %v2630_v58 = vpack.i.bf16 %v3250_v57, %v3248_v36 }
 0x14b   :  { %2631 = vrot.lane.b32.xlu1 %v2630_v58, %s2779_s21  ;;  %2641 = vrot.lane.b32.xlu0 %v2630_v58, %s2780_s2 }
 0x14f   :  { %2636 = vrot.lane.b32.xlu1 %v2635_v63, %s2780_s2  ;;  %2646 = vrot.lane.b32.xlu0 %v2635_v63, %s2779_s21 }
 0x153   :  { %2651 = vrot.lane.b32.xlu1 %v2650_v10, %s2779_s21  ;;  %2656 = vrot.lane.b32.xlu0 %v2650_v10, %s2780_s2 }
 0x155   :  { %v2507_v12 = vpop.permute.xlu0 %2506 }
 0x156   :  { %v2509_v13 = vunpack.i.h.bf16 %v2507_v12  ;;  %v2508_v16 = vunpack.i.l.bf16 %v2507_v12 }
 0x157   :  { %2661 = vrot.lane.b32.xlu1 %v2660_v11, %s2780_s2 }
 0x158   :  { %v1287_v24 = vsel %vm31_vm2, %v934_v18, %v2509_v13  ;;  %v1286_v25 = vsel %vm31_vm2, %v933_v17, %v2508_v16 }
 0x15d   :  { %v2517_v19 = vpop.permute.xlu1 %2516  ;;  %v2512_v30 = vpop.permute.xlu0 %2511 }
 0x15e   :  { %v2519_v20 = vunpack.i.h.bf16 %v2517_v19  ;;  %v2518_v21 = vunpack.i.l.bf16 %v2517_v19  ;;  %v2514_v32 = vunpack.i.h.bf16 %v2512_v30  ;;  %v2513_v41 = vunpack.i.l.bf16 %v2512_v30 }
 0x160   :  { %v1319_v26 = vsel %vm1318_vm3, %v1286_v25, %v2518_v21  ;;  %v1320_v29 = vsel %vm1318_vm3, %v1287_v24, %v2519_v20  ;;  %v1289_v48 = vsel %vm31_vm2, %v3004_v23, %v2514_v32  ;;  %v1288_v49 = vsel %vm31_vm2, %v3002_v22, %v2513_v41 }
 0x161   :  { %v1351_v31 = vpack.c.bf16 %v1320_v29, %v1319_v26 }
 0x163   :  { %2398 = vmatprep.mubr.msk.bf16.mxu1 %vm1391_vm4, %v1351_v31 }
 0x165   :  { %v2522_v43 = vpop.permute.xlu1 %2521  ;;  %v2527_v52 = vpop.permute.xlu0 %2526 }
 0x166   :  { %v2524_v46 = vunpack.i.h.bf16 %v2522_v43  ;;  %v2523_v47 = vunpack.i.l.bf16 %v2522_v43  ;;  %v2529_v58 = vunpack.i.h.bf16 %v2527_v52  ;;  %v2528_v63 = vunpack.i.l.bf16 %v2527_v52 }
 0x168   :  { %v1321_v50 = vsel %vm1318_vm3, %v1288_v49, %v2523_v47  ;;  %v1322_v51 = vsel %vm1318_vm3, %v1289_v48, %v2524_v46  ;;  %v1291_v9 = vsel %vm31_vm2, %v3034_v62, %v2529_v58  ;;  %v1290_v23 = vsel %vm31_vm2, %v3032_v61, %v2528_v63 }
 0x169   :  { %v1352_v35 = vpack.c.bf16 %v1322_v51, %v1321_v50 }
 0x16b   :  { %2399 = vmatmul.mubr.msk.bf16.vlgmr.msra.gmra.mxu1 %vm1391_vm4, %v1352_v35 }
 0x16d   :  { %v2537_v0 = vpop.permute.xlu0 %2536  ;;  %v2532_v22 = vpop.permute.xlu1 %2531 }
 0x16e   :  { %v2539_v1 = vunpack.i.h.bf16 %v2537_v0  ;;  %v2538_v6 = vunpack.i.l.bf16 %v2537_v0  ;;  %v2534_v13 = vunpack.i.h.bf16 %v2532_v22  ;;  %v2533_v16 = vunpack.i.l.bf16 %v2532_v22 }
 0x170   :  { %v1323_v10 = vsel %vm1318_vm3, %v1290_v23, %v2538_v6  ;;  %v1324_v11 = vsel %vm1318_vm3, %v1291_v9, %v2539_v1  ;;  %v1293_v20 = vsel %vm31_vm2, %v3063_v40, %v2534_v13  ;;  %v1292_v62 = vsel %vm31_vm2, %v3061_v39, %v2533_v16 }
 0x171   :  { %v1353_v12 = vpack.c.bf16 %v1324_v11, %v1323_v10 }
 0x173   :  { %2402 = vmatprep.mubr.msk.bf16.mxu1 %vm1391_vm4, %v1353_v12 }
 0x175   :  { %v2542_v17 = vpop.permute.xlu1 %2541  ;;  %v2547_v24 = vpop.permute.xlu0 %2546 }
 0x176   :  { %v2544_v18 = vunpack.i.h.bf16 %v2542_v17  ;;  %v2543_v19 = vunpack.i.l.bf16 %v2542_v17  ;;  %v2549_v26 = vunpack.i.h.bf16 %v2547_v24  ;;  %v2548_v29 = vunpack.i.l.bf16 %v2547_v24 }
 0x178   :  { %v1325_v61 = vsel %vm1318_vm3, %v1292_v62, %v2543_v19  ;;  %v1326_v21 = vsel %vm1318_vm3, %v1293_v20, %v2544_v18  ;;  %v1295_v41 = vsel %vm31_vm2, %v3084_v5, %v2549_v26  ;;  %v1294_v40 = vsel %vm31_vm2, %v3082_v4, %v2548_v29 }
 0x179   :  { %v1354_v25 = vpack.c.bf16 %v1326_v21, %v1325_v61 }
 0x17b   :  { %2403 = vmatmul.mubr.msk.bf16.gmra.mxu1 %vm1391_vm4, %v1354_v25 }
 0x17d   :  { %v2557_v30 = vpop.permute.xlu0 %2556  ;;  %v2552_v39 = vpop.permute.xlu1 %2551 }
 0x17e   :  { %v2559_v31 = vunpack.i.h.bf16 %v2557_v30  ;;  %v2558_v32 = vunpack.i.l.bf16 %v2557_v30  ;;  %v2554_v48 = vunpack.i.h.bf16 %v2552_v39  ;;  %v2553_v49 = vunpack.i.l.bf16 %v2552_v39 }
 0x180   :  { %v1327_v43 = vsel %vm1318_vm3, %v1294_v40, %v2558_v32  ;;  %v1328_v46 = vsel %vm1318_vm3, %v1295_v41, %v2559_v31  ;;  %v1297_v35 = vsel %vm31_vm2, %v3102_v28, %v2554_v48  ;;  %v1296_v5 = vsel %vm31_vm2, %v3100_v27, %v2553_v49 }
 0x181   :  { %v1355_v47 = vpack.c.bf16 %v1328_v46, %v1327_v43 }
 0x183   :  { %2406 = vmatprep.mubr.msk.bf16.mxu1 %vm1391_vm4, %v1355_v47 }
 0x185   :  { %v2562_v50 = vpop.permute.xlu1 %2561  ;;  %v2567_v63 = vpop.permute.xlu0 %2566 }
 0x186   :  { %v2564_v51 = vunpack.i.h.bf16 %v2562_v50  ;;  %v2563_v52 = vunpack.i.l.bf16 %v2562_v50  ;;  %v2569_v1 = vunpack.i.h.bf16 %v2567_v63  ;;  %v2568_v6 = vunpack.i.l.bf16 %v2567_v63 }
 0x188   :  { %v1329_v4 = vsel %vm1318_vm3, %v1296_v5, %v2563_v52  ;;  %v1330_v58 = vsel %vm1318_vm3, %v1297_v35, %v2564_v51  ;;  %v1299_v10 = vsel %vm31_vm2, %v3120_v54, %v2569_v1  ;;  %v1298_v28 = vsel %vm31_vm2, %v3118_v53, %v2568_v6 }
 0x189   :  { %v1356_v0 = vpack.c.bf16 %v1330_v58, %v1329_v4 }
 0x18b   :  { %2407 = vmatmul.mubr.msk.bf16.gmra.mxu1 %vm1391_vm4, %v1356_v0 }
 0x18d   :  { %v2577_v9 = vpop.permute.xlu0 %2576  ;;  %v2572_v27 = vpop.permute.xlu1 %2571 }
 0x18e   :  { %v2579_v23 = vunpack.i.h.bf16 %v2577_v9  ;;  %v2578_v22 = vunpack.i.l.bf16 %v2577_v9  ;;  %v2574_v16 = vunpack.i.h.bf16 %v2572_v27  ;;  %v2573_v17 = vunpack.i.l.bf16 %v2572_v27 }
 0x190   :  { %v1331_v11 = vsel %vm1318_vm3, %v1298_v28, %v2578_v22  ;;  %v1332_v12 = vsel %vm1318_vm3, %v1299_v10, %v2579_v23  ;;  %v1301_v62 = vsel %vm31_vm2, %v3138_v15, %v2574_v16  ;;  %v1300_v54 = vsel %vm31_vm2, %v3136_v14, %v2573_v17 }
 0x191   :  { %v1357_v13 = vpack.c.bf16 %v1332_v12, %v1331_v11 }
 0x193   :  { %2410 = vmatprep.mubr.msk.bf16.mxu1 %vm1391_vm4, %v1357_v13 }
 0x195   :  { %v2582_v18 = vpop.permute.xlu1 %2581  ;;  %v2587_v21 = vpop.permute.xlu0 %2586 }
 0x196   :  { %v2584_v19 = vunpack.i.h.bf16 %v2582_v18  ;;  %v2583_v20 = vunpack.i.l.bf16 %v2582_v18  ;;  %v2589_v25 = vunpack.i.h.bf16 %v2587_v21  ;;  %v2588_v26 = vunpack.i.l.bf16 %v2587_v21 }
 0x198   :  { %v1333_v53 = vsel %vm1318_vm3, %v1300_v54, %v2583_v20  ;;  %v1334_v61 = vsel %vm1318_vm3, %v1301_v62, %v2584_v19  ;;  %v1303_v32 = vsel %vm31_vm2, %v3156_v45, %v2589_v25  ;;  %v1302_v15 = vsel %vm31_vm2, %v3154_v44, %v2588_v26 }
 0x199   :  { %v1358_v24 = vpack.c.bf16 %v1334_v61, %v1333_v53 }
 0x19b   :  { %2411 = vmatmul.mubr.msk.bf16.gmra.mxu1 %vm1391_vm4, %v1358_v24 }
 0x19d   :  { %v2597_v29 = vpop.permute.xlu0 %2596  ;;  %v2592_v14 = vpop.permute.xlu1 %2591 }
 0x19e   :  { %v2599_v30 = vunpack.i.h.bf16 %v2597_v29  ;;  %v2598_v31 = vunpack.i.l.bf16 %v2597_v29  ;;  %v2594_v43 = vunpack.i.h.bf16 %v2592_v14  ;;  %v2593_v46 = vunpack.i.l.bf16 %v2592_v14 }
 0x1a0   :  { %v1335_v41 = vsel %vm1318_vm3, %v1302_v15, %v2598_v31  ;;  %v1336_v40 = vsel %vm1318_vm3, %v1303_v32, %v2599_v30  ;;  %v1305_v50 = vsel %vm31_vm2, %v3174_v8, %v2594_v43  ;;  %v1304_v45 = vsel %vm31_vm2, %v3172_v7, %v2593_v46 }
 0x1a1   :  { %v1359_v39 = vpack.c.bf16 %v1336_v40, %v1335_v41 }
 0x1a3   :  { %2414 = vmatprep.mubr.msk.bf16.mxu1 %vm1391_vm4, %v1359_v39 }
 0x1a5   :  { %v2602_v47 = vpop.permute.xlu1 %2601  ;;  %v2607_v52 = vpop.permute.xlu0 %2606 }
 0x1a6   :  { %v2604_v48 = vunpack.i.h.bf16 %v2602_v47  ;;  %v2603_v49 = vunpack.i.l.bf16 %v2602_v47  ;;  %v2609_v5 = vunpack.i.h.bf16 %v2607_v52  ;;  %v2608_v4 = vunpack.i.l.bf16 %v2607_v52 }
 0x1a8   :  { %v1337_v44 = vsel %vm1318_vm3, %v1304_v45, %v2603_v49  ;;  %v1338_v51 = vsel %vm1318_vm3, %v1305_v50, %v2604_v48  ;;  %v1307_v1 = vsel %vm31_vm2, %v3192_v37, %v2609_v5  ;;  %v1306_v8 = vsel %vm31_vm2, %v3190_v34, %v2608_v4 }
 0x1a9   :  { %v1360_v35 = vpack.c.bf16 %v1338_v51, %v1337_v44 }
 0x1ab   :  { %2415 = vmatmul.mubr.msk.bf16.gmra.mxu1 %vm1391_vm4, %v1360_v35 }
 0x1ad   :  { %v2617_v58 = vpop.permute.xlu0 %2616  ;;  %v2612_v7 = vpop.permute.xlu1 %2611 }
 0x1ae   :  { %v2619_v63 = vunpack.i.h.bf16 %v2617_v58  ;;  %v2618_v0 = vunpack.i.l.bf16 %v2617_v58  ;;  %v2614_v22 = vunpack.i.h.bf16 %v2612_v7  ;;  %v2613_v10 = vunpack.i.l.bf16 %v2612_v7 }
 0x1b0   :  { %v1339_v6 = vsel %vm1318_vm3, %v1306_v8, %v2618_v0  ;;  %v1340_v9 = vsel %vm1318_vm3, %v1307_v1, %v2619_v63  ;;  %v1309_v12 = vsel %vm31_vm2, %v3210_v3, %v2614_v22  ;;  %v1308_v37 = vsel %vm31_vm2, %v3208_v2, %v2613_v10  ;;  %v2732_v0 = vld [vmem:[%s3593_s3 + $0x38] sm:$0xff]  }
 0x1b1   :  { %v1361_v23 = vpack.c.bf16 %v1340_v9, %v1339_v6  ;;  %2431 = vmatpush3.bf16.msra.mxu1 %v2732_v0  ;;  %v2738_v0 = vld [vmem:[%s3593_s3 + $0x8] sm:$0xff]  }
 0x1b2   :  { %2432 = vmatprep.subr.bf16.mxu1 %v2778_v42 }
 0x1b3   :  { %2418 = vmatprep.mubr.msk.bf16.mxu1 %vm1391_vm4, %v1361_v23 }
 0x1b5   :  { %v2622_v28 = vpop.permute.xlu1 %2621  ;;  %v2627_v16 = vpop.permute.xlu0 %2626 }
 0x1b6   :  { %v2624_v27 = vunpack.i.h.bf16 %v2622_v28  ;;  %v2623_v11 = vunpack.i.l.bf16 %v2622_v28  ;;  %v2629_v18 = vunpack.i.h.bf16 %v2627_v16  ;;  %v2628_v19 = vunpack.i.l.bf16 %v2627_v16 }
 0x1b8   :  { %v1341_v34 = vsel %vm1318_vm3, %v1308_v37, %v2623_v11  ;;  %v1342_v13 = vsel %vm1318_vm3, %v1309_v12, %v2624_v27  ;;  %v1311_v3 = vsel %vm31_vm2, %v3228_v38, %v2629_v18  ;;  %v1310_v2 = vsel %vm31_vm2, %v3226_v33, %v2628_v19 }
 0x1b9   :  { %v1362_v17 = vpack.c.bf16 %v1342_v13, %v1341_v34 }
 0x1bb   :  { %2419 = vmatmul.mubr.msk.bf16.gmra.mxu1 %vm1391_vm4, %v1362_v17 }
 0x1bd   :  { %v2632_v20 = vpop.permute.xlu1 %2631  ;;  %v2642_v62 = vpop.permute.xlu0 %2641 }
 0x1be   :  { %v2644_v54 = vunpack.i.h.bf16 %v2642_v62  ;;  %v2643_v53 = vunpack.i.l.bf16 %v2642_v62  ;;  %v2634_v61 = vunpack.i.h.bf16 %v2632_v20  ;;  %v2633_v21 = vunpack.i.l.bf16 %v2632_v20 }
 0x1c0   :  { %v1343_v24 = vsel %vm1318_vm3, %v1310_v2, %v2643_v53  ;;  %v1344_v25 = vsel %vm1318_vm3, %v1311_v3, %v2644_v54  ;;  %v1313_v15 = vsel %vm31_vm2, %v3241_v56, %v2634_v61  ;;  %v1312_v38 = vsel %vm31_vm2, %v3239_v55, %v2633_v21  ;;  %v2733_v21 = vld [vmem:[%s3593_s3 + $0x30] sm:$0xff]  }
 0x1c1   :  { %v1363_v26 = vpack.c.bf16 %v1344_v25, %v1343_v24  ;;  %v2637_v29 = vpop.permute.xlu1 %2636  ;;  %v2647_v30 = vpop.permute.xlu0 %2646  ;;  %2433 = vmatpush3.bf16.msra.mxu1 %v2733_v21 }
 0x1c2   :  { %v2639_v31 = vunpack.i.h.bf16 %v2637_v29  ;;  %v2638_v32 = vunpack.i.l.bf16 %v2637_v29  ;;  %v2649_v14 = vunpack.i.h.bf16 %v2647_v30  ;;  %v2648_v41 = vunpack.i.l.bf16 %v2647_v30  ;;  %v2734_v29 = vld [vmem:[%s3593_s3 + $0x28] sm:$0xff]   ;;  %2434 = vmatprep.subr.bf16.mxu1 %v2778_v42 }
 0x1c3   :  { %2422 = vmatprep.mubr.msk.bf16.mxu1 %vm1391_vm4, %v1363_v26 }
 0x1c4   :  { %v1345_v33 = vsel %vm1318_vm3, %v1312_v38, %v2638_v32  ;;  %v1346_v40 = vsel %vm1318_vm3, %v1313_v15, %v2639_v31  ;;  %v1315_v49 = vsel %vm31_vm2, %v3250_v57, %v2649_v14  ;;  %v1314_v56 = vsel %vm31_vm2, %v3248_v36, %v2648_v41 }
 0x1c5   :  { %v1364_v39 = vpack.c.bf16 %v1346_v40, %v1345_v33  ;;  %v2652_v43 = vpop.permute.xlu1 %2651  ;;  %v2657_v46 = vpop.permute.xlu0 %2656  ;;  %2435 = vmatpush3.bf16.msra.mxu1 %v2734_v29 }
 0x1c6   :  { %v2659_v47 = vunpack.i.h.bf16 %v2657_v46  ;;  %v2658_v48 = vunpack.i.l.bf16 %v2657_v46  ;;  %v2654_v55 = vunpack.i.h.bf16 %v2652_v43  ;;  %v2653_v50 = vunpack.i.l.bf16 %v2652_v43  ;;  %2436 = vmatprep.subr.bf16.mxu1 %v2778_v42 }
 0x1c7   :  { %2423 = vmatmul.mubr.msk.bf16.gmra.mxu1 %vm1391_vm4, %v1364_v39 }
 0x1c8   :  { %v1347_v45 = vsel %vm1318_vm3, %v1314_v56, %v2658_v48  ;;  %v1348_v44 = vsel %vm1318_vm3, %v1315_v49, %v2659_v47  ;;  %v1317_v4 = vsel %vm31_vm2, %v3256_v60, %v2654_v55  ;;  %v1316_v57 = vsel %vm31_vm2, %v3254_v59, %v2653_v50  ;;  %v3384_v59 = vld [vmem:[%s3595_s5 + $0x2] ss:$0 sm:$0xff]  ;;  %v3389_v60 = vld [vmem:[%s3595_s5 + $0x3] ss:$0 sm:$0xff]  ;;  %v2736_v50 = vld [vmem:[%s3593_s3 + $0x18] sm:$0xff]  }
 0x1c9   :  { %v1365_v51 = vpack.c.bf16 %v1348_v44, %v1347_v45  ;;  %v2662_v52 = vpop.permute.xlu1 %2661  ;;  %v2735_v48 = vld [vmem:[%s3593_s3 + $0x20] sm:$0xff]  }
 0x1ca   :  { %v2664_v35 = vunpack.i.h.bf16 %v2662_v52  ;;  %v2663_v5 = vunpack.i.l.bf16 %v2662_v52  ;;  %2437 = vmatpush3.bf16.msra.mxu1 %v2735_v48 }
 0x1cb   :  { %2426 = vmatprep.mubr.msk.bf16.mxu1 %vm1391_vm4, %v1365_v51  ;;  %2438 = vmatprep.subr.bf16.mxu1 %v2778_v42 }
 0x1cc   :  { %v1349_v36 = vsel %vm1318_vm3, %v1316_v57, %v2663_v5  ;;  %v1350_v58 = vsel %vm1318_vm3, %v1317_v4, %v2664_v35  ;;  %v2737_v5 = vld [vmem:[%s3593_s3 + $0x10] sm:$0xff]  }
 0x1cd   :  { %v1366_v63 = vpack.c.bf16 %v1350_v58, %v1349_v36 }
 0x1ce   :  { %2439 = vmatpush3.bf16.msra.mxu1 %v2736_v50 }
 0x1cf   :  { %2427 = vmatmul.mubr.msk.bf16.gmra.mxu1 %vm1391_vm4, %v1366_v63  ;;  %2440 = vmatprep.subr.bf16.mxu1 %v2778_v42 }
 0x1d0   :  { %2446 = vmatprep.mubr.msk.bf16.mxu1 %vm2782_vm5, %v2778_v42 }
 0x1d2   :  { %2441 = vmatpush3.bf16.msra.mxu1 %v2737_v5 }
 0x1d3   :  { %2442 = vmatprep.subr.bf16.mxu1 %v2778_v42 }
 0x1d6   :  { %2443 = vmatpush3.bf16.msra.mxu1 %v2738_v0 }
 0x1d7   :  { %2444 = vmatprep.subr.bf16.mxu1 %v2778_v42 }
 0x22b   :  { %v2400_v1 = vpop.f32.mrf.mxu1 }
 0x22c   :  { %v1607_v8 = vmul.f32 %v2400_v1, %v3384_v59 }
 0x22d   :  { %v1474_v7 = vpop.f32.mrf.mxu1 }
 0x22e   :  { %v1643_v6 = vadd.f32 %v3389_v60, %v1607_v8  ;;  %v1605_v9 = vmul.f32 %v3384_v59, %v1474_v7 }
 0x22f   :  { %v2401_v23 = vpop.f32.mrf.mxu1 }
 0x230   :  { %v1641_v22 = vadd.f32 %v3389_v60, %v1605_v9  ;;  %v1608_v10 = vmul.f32 %v2401_v23, %v3384_v59  ;;  %v1675_v27 = vmax.f32 %v1643_v6, 0.0 }
 0x231   :  { %v1477_v28 = vpop.f32.mrf.mxu1 }
 0x232   :  { %v1673_v11 = vmax.f32 %v1641_v22, 0.0  ;;  %v1644_v12 = vadd.f32 %v3389_v60, %v1608_v10  ;;  %v1606_v37 = vmul.f32 %v3384_v59, %v1477_v28  ;;  %v2739_v22 = vld [vmem:[%s3593_s3] sm:$0xff]  }
 0x233   :  { %2445 = vmatpush3.bf16.msra.mxu1 %v2739_v22 }
 0x234   :  { %v3398_v34 = vmax.f32 %v1673_v11, %v1675_v27  ;;  %v1642_v13 = vadd.f32 %v3389_v60, %v1606_v37  ;;  %v1676_v16 = vmax.f32 %v1644_v12, 0.0  ;;  %2450 = vmatprep.subr.bf16.mxu1 %v2778_v42 }
 0x236   :  { %v1674_v17 = vmax.f32 %v1642_v13, 0.0 }
 0x238   :  { %v3401_v18 = vmax.f32 %v1674_v17, %v1676_v16 }
 0x23b   :  { %v2404_v19 = vpop.f32.mrf.mxu1 }
 0x23c   :  { %v1611_v62 = vmul.f32 %v2404_v19, %v3384_v59 }
 0x23d   :  { %v1490_v20 = vpop.f32.mrf.mxu1 }
 0x23e   :  { %v1609_v54 = vmul.f32 %v3384_v59, %v1490_v20  ;;  %v1647_v24 = vadd.f32 %v3389_v60, %v1611_v62 }
 0x23f   :  { %v2405_v53 = vpop.f32.mrf.mxu1 }
 0x240   :  { %v1645_v3 = vadd.f32 %v3389_v60, %v1609_v54  ;;  %v1612_v2 = vmul.f32 %v2405_v53, %v3384_v59  ;;  %v1679_v32 = vmax.f32 %v1647_v24, 0.0 }
 0x241   :  { %v1493_v61 = vpop.f32.mrf.mxu1 }
 0x242   :  { %v1648_v25 = vadd.f32 %v3389_v60, %v1612_v2  ;;  %v1610_v26 = vmul.f32 %v3384_v59, %v1493_v61  ;;  %v1677_v30 = vmax.f32 %v1645_v3, 0.0 }
 0x244   :  { %v1646_v31 = vadd.f32 %v3389_v60, %v1610_v26  ;;  %v1680_v15 = vmax.f32 %v1648_v25, 0.0  ;;  %v1707_v14 = vmax.f32 %v1677_v30, %v1679_v32 }
 0x246   :  { %v1678_v38 = vmax.f32 %v1646_v31, 0.0 }
 0x248   :  { %v1708_v41 = vmax.f32 %v1678_v38, %v1680_v15 }
 0x24a   :  { %v2665_v33 = vpack.i.bf16 %v1708_v41, %v1707_v14 }
 0x24b   :  { %v2408_v40 = vpop.f32.mrf.mxu1 }
 0x24c   :  { %2666 = vrot.lane.b32.xlu0 %v2665_v33, %s2780_s2  ;;  %v1615_v43 = vmul.f32 %v2408_v40, %v3384_v59 }
 0x24d   :  { %v1506_v39 = vpop.f32.mrf.mxu1 }
 0x24e   :  { %v1613_v46 = vmul.f32 %v3384_v59, %v1506_v39  ;;  %v1651_v45 = vadd.f32 %v3389_v60, %v1615_v43 }
 0x24f   :  { %v2409_v47 = vpop.f32.mrf.mxu1 }
 0x250   :  { %v1649_v49 = vadd.f32 %v3389_v60, %v1613_v46  ;;  %v1616_v56 = vmul.f32 %v2409_v47, %v3384_v59  ;;  %v1683_v4 = vmax.f32 %v1651_v45, 0.0 }
 0x251   :  { %v1509_v55 = vpop.f32.mrf.mxu1 }
 0x252   :  { %v1652_v44 = vadd.f32 %v3389_v60, %v1616_v56  ;;  %v1614_v51 = vmul.f32 %v3384_v59, %v1509_v55  ;;  %v1681_v52 = vmax.f32 %v1649_v49, 0.0 }
 0x254   :  { %v1650_v35 = vadd.f32 %v3389_v60, %v1614_v51  ;;  %v1684_v57 = vmax.f32 %v1652_v44, 0.0  ;;  %v1709_v58 = vmax.f32 %v1681_v52, %v1683_v4 }
 0x256   :  { %v1682_v36 = vmax.f32 %v1650_v35, 0.0 }
 0x258   :  { %v1710_v63 = vmax.f32 %v1682_v36, %v1684_v57 }
 0x25a   :  { %v2670_v1 = vpack.i.bf16 %v1710_v63, %v1709_v58 }
 0x25b   :  { %v2412_v8 = vpop.f32.mrf.mxu1 }
 0x25c   :  { %2671 = vrot.lane.b32.xlu1 %v2670_v1, %s2781_s17  ;;  %v1619_v6 = vmul.f32 %v2412_v8, %v3384_v59 }
 0x25d   :  { %v1522_v7 = vpop.f32.mrf.mxu1 }
 0x25e   :  { %v1617_v9 = vmul.f32 %v3384_v59, %v1522_v7  ;;  %v1655_v11 = vadd.f32 %v3389_v60, %v1619_v6 }
 0x25f   :  { %v2413_v23 = vpop.f32.mrf.mxu1 }
 0x260   :  { %v1653_v10 = vadd.f32 %v3389_v60, %v1617_v9  ;;  %v1620_v28 = vmul.f32 %v2413_v23, %v3384_v59  ;;  %v1687_v17 = vmax.f32 %v1655_v11, 0.0 }
 0x261   :  { %v1525_v27 = vpop.f32.mrf.mxu1 }
 0x262   :  { %v1656_v12 = vadd.f32 %v3389_v60, %v1620_v28  ;;  %v1618_v37 = vmul.f32 %v3384_v59, %v1525_v27  ;;  %v1685_v13 = vmax.f32 %v1653_v10, 0.0 }
 0x264   :  { %v1654_v16 = vadd.f32 %v3389_v60, %v1618_v37  ;;  %v1688_v19 = vmax.f32 %v1656_v12, 0.0  ;;  %v1711_v62 = vmax.f32 %v1685_v13, %v1687_v17 }
 0x266   :  { %v1686_v20 = vmax.f32 %v1654_v16, 0.0 }
 0x268   :  { %v1712_v54 = vmax.f32 %v1686_v20, %v1688_v19 }
 0x26a   :  { %v2675_v53 = vpack.i.bf16 %v1712_v54, %v1711_v62 }
 0x26b   :  { %v2416_v3 = vpop.f32.mrf.mxu1 }
 0x26c   :  { %v1623_v2 = vmul.f32 %v2416_v3, %v3384_v59  ;;  %2676 = vrot.lane.b32.xlu0 %v2675_v53, %s2783_s19 }
 0x26d   :  { %v1538_v61 = vpop.f32.mrf.mxu1 }
 0x26e   :  { %v1659_v21 = vadd.f32 %v3389_v60, %v1623_v2  ;;  %v1621_v24 = vmul.f32 %v3384_v59, %v1538_v61 }
 0x26f   :  { %v2417_v25 = vpop.f32.mrf.mxu1 }
 0x270   :  { %v1657_v26 = vadd.f32 %v3389_v60, %v1621_v24  ;;  %v1624_v29 = vmul.f32 %v2417_v25, %v3384_v59  ;;  %v1691_v31 = vmax.f32 %v1659_v21, 0.0 }
 0x271   :  { %v1541_v30 = vpop.f32.mrf.mxu1 }
 0x272   :  { %v1689_v32 = vmax.f32 %v1657_v26, 0.0  ;;  %v1660_v15 = vadd.f32 %v3389_v60, %v1624_v29  ;;  %v1622_v38 = vmul.f32 %v3384_v59, %v1541_v30 }
 0x274   :  { %v3469_v14 = vmax.f32 %v1689_v32, %v1691_v31  ;;  %v1658_v41 = vadd.f32 %v3389_v60, %v1622_v38  ;;  %v1692_v33 = vmax.f32 %v1660_v15, 0.0  ;;  %v2748_v32 = vld [vmem:[%s3594_s4 + $0x38] sm:$0xff]  }
 0x275   :  { %2471 = vmatpush3.bf16.msra.mxu0 %v2748_v32 }
 0x276   :  { %v1690_v40 = vmax.f32 %v1658_v41, 0.0  ;;  %2472 = vmatprep.subr.bf16.mxu0 %v2778_v42 }
 0x278   :  { %v3472_v39 = vmax.f32 %v1690_v40, %v1692_v33  ;;  %v2749_v33 = vld [vmem:[%s3594_s4 + $0x30] sm:$0xff]  }
 0x279   :  { %2473 = vmatpush3.bf16.msra.mxu0 %v2749_v33 }
 0x27a   :  { %2474 = vmatprep.subr.bf16.mxu0 %v2778_v42 }
 0x27b   :  { %v2420_v43 = vpop.f32.mrf.mxu1 }
 0x27c   :  { %v1627_v47 = vmul.f32 %v2420_v43, %v3384_v59 }
 0x27d   :  { %v1554_v46 = vpop.f32.mrf.mxu1 }
 0x27e   :  { %v1625_v48 = vmul.f32 %v3384_v59, %v1554_v46  ;;  %v1663_v45 = vadd.f32 %v3389_v60, %v1627_v47  ;;  %v2751_v46 = vld [vmem:[%s3594_s4 + $0x20] sm:$0xff]  }
 0x27f   :  { %v2421_v49 = vpop.f32.mrf.mxu1 }
 0x280   :  { %v1661_v56 = vadd.f32 %v3389_v60, %v1625_v48  ;;  %v1628_v55 = vmul.f32 %v2421_v49, %v3384_v59  ;;  %v1695_v5 = vmax.f32 %v1663_v45, 0.0 }
 0x281   :  { %v1557_v50 = vpop.f32.mrf.mxu1 }
 0x282   :  { %v1664_v44 = vadd.f32 %v3389_v60, %v1628_v55  ;;  %v1626_v51 = vmul.f32 %v3384_v59, %v1557_v50  ;;  %v1693_v52 = vmax.f32 %v1661_v56, 0.0 }
 0x284   :  { %v1662_v35 = vadd.f32 %v3389_v60, %v1626_v51  ;;  %v1696_v4 = vmax.f32 %v1664_v44, 0.0  ;;  %v1715_v58 = vmax.f32 %v1693_v52, %v1695_v5 }
 0x286   :  { %v1694_v57 = vmax.f32 %v1662_v35, 0.0 }
 0x287   :  { %v2424_v36 = vpop.f32.mrf.mxu1 }
 0x288   :  { %v1716_v63 = vmax.f32 %v1694_v57, %v1696_v4  ;;  %v1631_v0 = vmul.f32 %v2424_v36, %v3384_v59 }
 0x289   :  { %v1570_v1 = vpop.f32.mrf.mxu1 }
 0x28a   :  { %v1629_v8 = vmul.f32 %v3384_v59, %v1570_v1  ;;  %v2680_v7 = vpack.i.bf16 %v1716_v63, %v1715_v58  ;;  %v1667_v22 = vadd.f32 %v3389_v60, %v1631_v0  ;;  %v2740_v58 = vld [vmem:[%s3593_s3 + $0x78] sm:$0xff]   ;;  %v2743_v0 = vld [vmem:[%s3593_s3 + $0x60] sm:$0xff]  }
 0x28b   :  { %v2425_v6 = vpop.f32.mrf.mxu1  ;;  %v2744_v1 = vld [vmem:[%s3593_s3 + $0x58] sm:$0xff]  }
 0x28c   :  { %v1665_v9 = vadd.f32 %v3389_v60, %v1629_v8  ;;  %v1632_v23 = vmul.f32 %v2425_v6, %v3384_v59  ;;  %2681 = vrot.lane.b32.xlu1 %v2680_v7, %s2780_s2  ;;  %v1699_v13 = vmax.f32 %v1667_v22, 0.0  ;;  %v2745_v8 = vld [vmem:[%s3593_s3 + $0x50] sm:$0xff]   ;;  %v2746_v7 = vld [vmem:[%s3593_s3 + $0x48] sm:$0xff]   ;;  %v2747_v6 = vld [vmem:[%s3593_s3 + $0x40] sm:$0xff]  }
 0x28d   :  { %v1573_v10 = vpop.f32.mrf.mxu1 }
 0x28e   :  { %v1668_v28 = vadd.f32 %v3389_v60, %v1632_v23  ;;  %v1630_v27 = vmul.f32 %v3384_v59, %v1573_v10  ;;  %v1697_v12 = vmax.f32 %v1665_v9, 0.0 }
 0x28f   :  { %v2428_v11 = vpop.f32.mrf.mxu1 }
 0x290   :  { %v1666_v37 = vadd.f32 %v3389_v60, %v1630_v27  ;;  %v1700_v17 = vmax.f32 %v1668_v28, 0.0  ;;  %v1635_v20 = vmul.f32 %v2428_v11, %v3384_v59  ;;  %v1717_v53 = vmax.f32 %v1697_v12, %v1699_v13 }
 0x291   :  { %v1586_v16 = vpop.f32.mrf.mxu1 }
 0x292   :  { %v1698_v19 = vmax.f32 %v1666_v37, 0.0  ;;  %v1633_v62 = vmul.f32 %v3384_v59, %v1586_v16  ;;  %v1671_v24 = vadd.f32 %v3389_v60, %v1635_v20 }
 0x293   :  { %v2429_v54 = vpop.f32.mrf.mxu1 }
 0x294   :  { %v1718_v3 = vmax.f32 %v1698_v19, %v1700_v17  ;;  %v1669_v2 = vadd.f32 %v3389_v60, %v1633_v62  ;;  %v1636_v61 = vmul.f32 %v2429_v54, %v3384_v59  ;;  %v1703_v15 = vmax.f32 %v1671_v24, 0.0 }
 0x295   :  { %v1589_v21 = vpop.f32.mrf.mxu1 }
 0x296   :  { %v1672_v25 = vadd.f32 %v3389_v60, %v1636_v61  ;;  %v1634_v26 = vmul.f32 %v3384_v59, %v1589_v21  ;;  %v2685_v29 = vpack.i.bf16 %v1718_v3, %v1717_v53  ;;  %v1701_v30 = vmax.f32 %v1669_v2, 0.0  ;;  %v2752_v53 = vld [vmem:[%s3594_s4 + $0x18] sm:$0xff]   ;;  %v2755_v3 = vld [vmem:[%s3594_s4] sm:$0xff]  }
 0x298   :  { %v1670_v31 = vadd.f32 %v3389_v60, %v1634_v26  ;;  %2686 = vrot.lane.b32.xlu0 %v2685_v29, %s2781_s17  ;;  %v1704_v38 = vmax.f32 %v1672_v25, 0.0  ;;  %v1719_v59 = vmax.f32 %v1701_v30, %v1703_v15  ;;  %v2750_v60 = vld [vmem:[%s3594_s4 + $0x28] sm:$0xff]   ;;  %v2197_v25 = vld [vmem:[%s3595_s5 + $0x4] ss:$0 sm:$0xff] }
 0x299   :  { %2475 = vmatpush3.bf16.msra.mxu0 %v2750_v60 }
 0x29a   :  { %v1702_v41 = vmax.f32 %v1670_v31, 0.0  ;;  %2476 = vmatprep.subr.bf16.mxu0 %v2778_v42 }
 0x29c   :  { %v1720_v40 = vmax.f32 %v1702_v41, %v1704_v38 }
 0x29d   :  { %2477 = vmatpush3.bf16.msra.mxu0 %v2751_v46 }
 0x29e   :  { %v2690_v43 = vpack.i.bf16 %v1720_v40, %v1719_v59  ;;  %2478 = vmatprep.subr.bf16.mxu0 %v2778_v42  ;;  %v2235_v40 = vld [vmem:[%s3595_s5 + $0x5] ss:$0 sm:$0xff] }
 0x2a0   :  { %2691 = vrot.lane.b32.xlu1 %v2690_v43, %s2783_s19 }
 0x2a1   :  { %2479 = vmatpush3.bf16.msra.mxu0 %v2752_v53 }
 0x2a2   :  { %2480 = vmatprep.subr.bf16.mxu0 %v2778_v42 }
 0x2be   :  { %v2667_v47 = vpop.permute.xlu0 %2666 }
 0x2bf   :  { %v2669_v49 = vunpack.i.h.bf16 %v2667_v47  ;;  %v2668_v56 = vunpack.i.l.bf16 %v2667_v47 }
 0x2c1   :  { %v1746_v44 = vsel %vm1318_vm3, %v3401_v18, %v2669_v49  ;;  %v1745_v51 = vsel %vm1318_vm3, %v3398_v34, %v2668_v56  ;;  %v2741_v34 = vld [vmem:[%s3593_s3 + $0x70] sm:$0xff]   ;;  %v2742_v18 = vld [vmem:[%s3593_s3 + $0x68] sm:$0xff]  }
 0x2ce   :  { %v2672_v48 = vpop.permute.xlu1 %2671 }
 0x2cf   :  { %v2674_v55 = vunpack.i.h.bf16 %v2672_v48  ;;  %v2673_v50 = vunpack.i.l.bf16 %v2672_v48 }
 0x2d1   :  { %v1749_v5 = vsel %vm1747_vm6, %v1746_v44, %v2674_v55  ;;  %v1748_v4 = vsel %vm1747_vm6, %v1745_v51, %v2673_v50 }
 0x2de   :  { %v2677_v45 = vpop.permute.xlu0 %2676 }
 0x2df   :  { %v2679_v52 = vunpack.i.h.bf16 %v2677_v45  ;;  %v2678_v35 = vunpack.i.l.bf16 %v2677_v45 }
 0x2e1   :  { %v1752_v57 = vsel %vm1750_vm7, %v1749_v5, %v2679_v52  ;;  %v1751_v36 = vsel %vm1750_vm7, %v1748_v4, %v2678_v35 }
 0x2e2   :  { %v1769_v63 = vpack.c.bf16 %v1752_v57, %v1751_v36 }
 0x2e4   :  { %2447 = vmatmul.mubr.bf16.vlgmr.msra.gmra.mxu1 %v1769_v63 }
 0x2e5   :  { %2451 = vmatpush3.bf16.msra.mxu1 %v2740_v58  ;;  %2466 = vmatprep.mubr.msk.bf16.mxu1 %vm2782_vm5, %v2778_v42 }
 0x2e6   :  { %2452 = vmatprep.subr.bf16.mxu1 %v2778_v42 }
 0x2e9   :  { %2453 = vmatpush3.bf16.msra.mxu1 %v2741_v34 }
 0x2ea   :  { %2454 = vmatprep.subr.bf16.mxu1 %v2778_v42 }
 0x2ed   :  { %2455 = vmatpush3.bf16.msra.mxu1 %v2742_v18 }
 0x2ee   :  { %2456 = vmatprep.subr.bf16.mxu1 %v2778_v42 }
 0x2f1   :  { %2457 = vmatpush3.bf16.msra.mxu1 %v2743_v0 }
 0x2f2   :  { %2458 = vmatprep.subr.bf16.mxu1 %v2778_v42 }
 0x2f5   :  { %2459 = vmatpush3.bf16.msra.mxu1 %v2744_v1 }
 0x2f6   :  { %2460 = vmatprep.subr.bf16.mxu1 %v2778_v42 }
 0x2f9   :  { %2461 = vmatpush3.bf16.msra.mxu1 %v2745_v8 }
 0x2fa   :  { %2462 = vmatprep.subr.bf16.mxu1 %v2778_v42 }
 0x2fd   :  { %2463 = vmatpush3.bf16.msra.mxu1 %v2746_v7 }
 0x2fe   :  { %2464 = vmatprep.subr.bf16.mxu1 %v2778_v42  ;;  %v2682_v9 = vpop.permute.xlu1 %2681 }
 0x2ff   :  { %v2684_v22 = vunpack.i.h.bf16 %v2682_v9  ;;  %v2683_v10 = vunpack.i.l.bf16 %v2682_v9 }
 0x301   :  { %2465 = vmatpush3.bf16.msra.mxu1 %v2747_v6  ;;  %v1886_v12 = vsel %vm1318_vm3, %v3472_v39, %v2684_v22  ;;  %v1885_v37 = vsel %vm1318_vm3, %v3469_v14, %v2683_v10  ;;  %v2753_v14 = vld [vmem:[%s3594_s4 + $0x10] sm:$0xff]   ;;  %v2754_v39 = vld [vmem:[%s3594_s4 + $0x8] sm:$0xff]  }
 0x302   :  { %2481 = vmatpush3.bf16.msra.mxu0 %v2753_v14 }
 0x303   :  { %2482 = vmatprep.subr.bf16.mxu0 %v2778_v42 }
 0x306   :  { %2483 = vmatpush3.bf16.msra.mxu0 %v2754_v39 }
 0x307   :  { %2484 = vmatprep.subr.bf16.mxu0 %v2778_v42 }
 0x30a   :  { %v2687_v23 = vpop.permute.xlu0 %2686  ;;  %2485 = vmatpush3.bf16.msra.mxu0 %v2755_v3 }
 0x30b   :  { %v2689_v28 = vunpack.i.h.bf16 %v2687_v23  ;;  %v2688_v27 = vunpack.i.l.bf16 %v2687_v23 }
 0x30d   :  { %v1888_v17 = vsel %vm1747_vm6, %v1886_v12, %v2689_v28  ;;  %v1887_v19 = vsel %vm1747_vm6, %v1885_v37, %v2688_v27 }
 0x312   :  { %v2692_v11 = vpop.permute.xlu1 %2691 }
 0x313   :  { %v2694_v13 = vunpack.i.h.bf16 %v2692_v11  ;;  %v2693_v16 = vunpack.i.l.bf16 %v2692_v11 }
 0x315   :  { %v1890_v20 = vsel %vm1750_vm7, %v1888_v17, %v2694_v13  ;;  %v1889_v62 = vsel %vm1750_vm7, %v1887_v19, %v2693_v16 }
 0x316   :  { %v1907_v54 = vpack.c.bf16 %v1890_v20, %v1889_v62 }
 0x318   :  { %2467 = vmatmul.mubr.bf16.vlgmr.msra.gmra.mxu1 %v1907_v54 }
 0x3a4   :  { %v1852_v2 = vpop.f32.mrf.mxu1 }
 0x3a5   :  { %v1859_v29 = vadd.f32 %v2197_v25, %v1852_v2 }
 0x3a6   :  { %v2448_v61 = vpop.f32.mrf.mxu1 }
 0x3a8   :  { %v1855_v21 = vpop.f32.mrf.mxu1 }
 0x3a9   :  { %v1860_v31 = vadd.f32 %v2197_v25, %v1855_v21 }
 0x3aa   :  { %v2449_v24 = vpop.f32.mrf.mxu1 }
 0x3d8   :  { %v1990_v26 = vpop.f32.mrf.mxu1 }
 0x3d9   :  { %v1997_v32 = vadd.f32 %v1990_v26, %v1859_v29 }
 0x3da   :  { %v2468_v30 = vpop.f32.mrf.mxu1 }
 0x3db   :  { %v1999_v33 = vmax.f32 %v1997_v32, 0.0 }
 0x3dc   :  { %v1993_v15 = vpop.f32.mrf.mxu1 }
 0x3dd   :  { %v1998_v38 = vadd.f32 %v1993_v15, %v1860_v31 }
 0x3de   :  { %v2469_v41 = vpop.f32.mrf.mxu1 }
 0x3df   :  { %v2000_v59 = vmax.f32 %v1998_v38, 0.0 }
 0x3e1   :  { %v2001_v42 = vpack.c.bf16 %v2000_v59, %v1999_v33 }
 0x3e3   :  { %2487 = vmatmul.mubr.bf16.vlgmr.msra.gmra.mxu0 %v2001_v42 }
 0x4a3   :  { %v2104_v43 = vpop.f32.mrf.mxu0 }
 0x4a4   :  { %v2105_v60 = vadd.f32 %v2235_v40, %v2104_v43 }
 0x4a5   :  { %v2488_v46 = vpop.f32.mrf.mxu0 }
 0x4a6   :  { %2111 = vst [vmem:[#allocation3] sm:$0xff] %v2105_v60 }
 0x4a7   :  { %v2107_v47 = vpop.f32.mrf.mxu0 }
 0x4a8   :  { %v2108_v48 = vadd.f32 %v2235_v40, %v2107_v47 }
 0x4a9   :  { %v2489_v49 = vpop.f32.mrf.mxu0 }
 0x4aa   :  { %2112 = vst [vmem:[#allocation3 + $0x8] sm:$0xff] %v2108_v48 }
 0x4ab   :  { %2767 = shalt.err (!%p2764_p4)
}
 0x4ac   :  { %s2785_s1 = smov 128   ;;  %s2786_s5 = smov 8  }
 0x4ad   :  { %2124 = dma.vmem_to_hbm [thread:$0]  %s2119_s27, 256, %s3596_s6, [#allocation4], %s2785_s1, %s2785_s1, %s2786_s5  }
 0x4ae   :  { %2776 = dma.done.wait [#allocation4], 256  }
 0x4af   :  { %2777 = vsyncadd [#allocation4], 4294967040 }
 0x4b0   :  { %2128 = vsyncpa [#allocation4], 1 }

</bundles_post_ra>
